<compile_context>
chip_gen: v5e
topology: v5e:2x2
jax: 0.10.0
libtpu: 0.0.40
codegen_flags: <defaults>
</compile_context>

<pallas_src>
import jax
import jax.numpy as jnp
from jax import lax
from jax.experimental import pallas as pl
from jax.experimental.pallas import tpu as pltpu


def _round_up(x, m):
    return ((x + m - 1) // m) * m


def _choose_time_chunk(T, Bp, Hp, itemsize, slab_budget_bytes):
    """Pick the time chunk TT and padded time length Tp.

    Per-chunk pipelined slabs are ~(2 inputs + 2 outputs) x double-buffered:
    8 * TT * Bp * Hp * itemsize bytes.  TT is capped so those slabs fit the VMEM
    budget; if no divisor of T is close to the cap, T is padded (the kernel masks
    the padded steps), so the heuristic never falls back to TT=1.
    """
    per_step = 8 * Bp * Hp * itemsize
    cap = max(int(slab_budget_bytes // per_step), 1)
    cap = min(cap, 256, T)
    # Prefer a divisor of T near the cap (no time padding needed).
    for tt in range(cap, max(cap // 2, 1) - 1, -1):
        if T % tt == 0:
            return tt, T
    return cap, _round_up(T, cap)


def _make_kernel(TT, T_valid, Tp, Hp, num_chunks, mm_dtype):
    needs_mask = Tp != T_valid

    def kernel(xfw_ref, xbw_ref, whh_ref, h0_ref, ofw_ref, obw_ref, hT_ref, h_scr):
        # NOTE: the cross-chunk carry in h_scr requires the single time-chunk grid axis
        # to be iterated sequentially in order on one core; it is marked "arbitrary".
        c = pl.program_id(0)

        @pl.when(c == 0)
        def _():
            h_scr[...] = h0_ref[...].astype(jnp.float32)

        if needs_mask:
            lane = lax.broadcasted_iota(jnp.int32, (1, 2 * Hp), 1)
            is_fw_lane = lane < Hp

        def step(i, h):
            # fw consumes local time i of chunk c; bw consumes local time TT-1-i of
            # chunk C-1-c (padded time Tp-1-k for serial step k = c*TT + i), which also
            # realigns the backward outputs to their original time index for free.
            xp = jnp.concatenate([xfw_ref[i], xbw_ref[TT - 1 - i]], axis=-1)
            # W_hh streams from its resident VMEM block each step (not hoisted to vregs).
            acc = jnp.dot(h.astype(mm_dtype), whh_ref[...],
                          preferred_element_type=jnp.float32)
            h_new = jnp.tanh(xp.astype(jnp.float32) + acc)
            if needs_mask:
                k = c * TT + i
                # fw is valid for k < T (padding at the end of the serial sweep),
                # bw is valid for k >= Tp - T (padding at the start).
                valid = jnp.where(is_fw_lane, k < T_valid, k >= Tp - T_valid)
                h_new = jnp.where(valid, h_new, h)
            ofw_ref[i] = h_new[:, :Hp].astype(ofw_ref.dtype)
            obw_ref[TT - 1 - i] = h_new[:, Hp:].astype(obw_ref.dtype)
            return h_new

        # Hidden state lives in vregs for the whole chunk; partial unroll lets the
        # scheduler overlap step i+1 input loads with step i compute.
        h_final = lax.fori_loop(0, TT, step, h_scr[...], unroll=min(TT, 8))
        h_scr[...] = h_final

        @pl.when(c == num_chunks - 1)
        def _():
            hT_ref[...] = h_final.astype(hT_ref.dtype)

    return kernel


def bidirectional_rnn(x, m_prev, fw_params, bw_params, *, time_chunk=None,
                      recurrent_dtype=None, slab_budget_bytes=8 << 20):
    """Equivalent of BidirectionalRNN.forward.

    x: (T, B, D); m_prev: [h_fw (B, H), h_bw (B, H)]
    fw_params / bw_params: (W_ih (D, H), W_hh (H, H), b (1, H))
    returns (out (T, B, 2H), [h_fw_new, h_bw_new])
    """
    assert x.ndim == 3
    T, B, D = x.shape
    w_ih_f, w_hh_f, b_f = fw_params
    w_ih_b, w_hh_b, b_b = bw_params
    H = w_hh_f.shape[0]

    Bp = _round_up(B, 8)       # sublane tile
    Hp = _round_up(H, 128)     # lane tile
    out_dtype = x.dtype
    mm_dtype = jnp.dtype(recurrent_dtype) if recurrent_dtype is not None \
        else jnp.dtype(w_hh_f.dtype)
    itemsize = jnp.dtype(out_dtype).itemsize

    if time_chunk is None:
        TT, Tp = _choose_time_chunk(T, Bp, Hp, itemsize, slab_budget_bytes)
    else:
        TT = int(time_chunk)
        Tp = _round_up(T, TT)
    num_chunks = Tp // TT

    # ---- Hoisted input projection: ONE einsum, already in fused kernel layout ----
    x_p = jnp.pad(x, ((0, 0), (0, Bp - B), (0, 0))) if Bp != B else x
    w_ih_cat = jnp.zeros((D, 2 * Hp), x.dtype)
    w_ih_cat = w_ih_cat.at[:, :H].set(w_ih_f).at[:, Hp:Hp + H].set(w_ih_b)
    b_cat = jnp.zeros((1, 2 * Hp), x.dtype)
    b_cat = b_cat.at[:, :H].set(b_f).at[:, Hp:Hp + H].set(b_b)
    x_proj = (jnp.einsum("tbd,dh->tbh", x_p, w_ih_cat) + b_cat).astype(out_dtype)
    if Tp != T:
        x_proj = jnp.pad(x_proj, ((0, Tp - T), (0, 0), (0, 0)))  # padded steps are masked

    # Block-diagonal recurrent weights: fw in the top-left, bw in the bottom-right.
    # Zero padding keeps the padded lanes of h exactly zero through the recurrence.
    w_hh = jnp.zeros((2 * Hp, 2 * Hp), mm_dtype)
    w_hh = w_hh.at[:H, :H].set(w_hh_f.astype(mm_dtype))
    w_hh = w_hh.at[Hp:Hp + H, Hp:Hp + H].set(w_hh_b.astype(mm_dtype))

    # Fused initial hidden state [h_fw || h_bw].
    h0 = jnp.zeros((Bp, 2 * Hp), jnp.float32)
    h0 = h0.at[:B, :H].set(m_prev[0].astype(jnp.float32))
    h0 = h0.at[:B, Hp:Hp + H].set(m_prev[1].astype(jnp.float32))

    # VMEM sizing: double-buffered in/out slabs + resident weights/h0/hT/scratch.
    est = (8 * TT * Bp * Hp * itemsize
           + 2 * (2 * Hp) * (2 * Hp) * jnp.dtype(mm_dtype).itemsize
           + 6 * Bp * 2 * Hp * 4)
    vmem_limit = int(min(max(2 * est + (4 << 20), 32 << 20), 64 << 20))

    kernel = _make_kernel(TT, T, Tp, Hp, num_chunks, mm_dtype)

    out_fw, out_bw, hT = pl.pallas_call(
        kernel,
        out_shape=(jax.ShapeDtypeStruct((Tp, Bp, Hp), out_dtype),
                   jax.ShapeDtypeStruct((Tp, Bp, Hp), out_dtype),
                   jax.ShapeDtypeStruct((Bp, 2 * Hp), out_dtype)),
        grid_spec=pltpu.PrefetchScalarGridSpec(
            num_scalar_prefetch=0,
            grid=(num_chunks,),
            in_specs=[
                # fw half of the pre-projected inputs, time chunk c
                pl.BlockSpec((TT, Bp, Hp), lambda c: (c, 0, 0)),
                # bw half, time chunk C-1-c (time reversal done by the index_map)
                pl.BlockSpec((TT, Bp, Hp), lambda c: (num_chunks - 1 - c, 0, 1)),
                # fused block-diagonal recurrent weights: resident across all chunks
                pl.BlockSpec((2 * Hp, 2 * Hp), lambda c: (0, 0)),
                # fused initial hidden state
                pl.BlockSpec((Bp, 2 * Hp), lambda c: (0, 0)),
            ],
            out_specs=[
                pl.BlockSpec((TT, Bp, Hp), lambda c: (c, 0, 0)),
                pl.BlockSpec((TT, Bp, Hp), lambda c: (num_chunks - 1 - c, 0, 0)),
                pl.BlockSpec((Bp, 2 * Hp), lambda c: (0, 0)),
            ],
            scratch_shapes=[pltpu.VMEM((Bp, 2 * Hp), jnp.float32)],  # cross-chunk carry
        ),
        compiler_params=pltpu.CompilerParams(
            dimension_semantics=("arbitrary",),   # serial dependency chain over time
            vmem_limit_bytes=vmem_limit),
    )(x_proj, x_proj, w_hh, h0)

    h_fw = hT[:B, :H].astype(m_prev[0].dtype)
    h_bw = hT[:B, Hp:Hp + H].astype(m_prev[1].dtype)
    # TODO(synk): if downstream can consume the padded (Tp, Bp, Hp) per-direction
    # outputs directly, this de-pad + concat HBM pass can be skipped entirely.
    out = jnp.concatenate([out_fw[:T, :B, :H], out_bw[:T, :B, :H]], axis=-1)
    return out, [h_fw, h_bw]


# ---------------------------------------------------------------------------
# Parameter init / reference (pure JAX) for validation
# ---------------------------------------------------------------------------

def standard_init(key, D, H):
    """Deterministic uniform(-1/sqrt(H), 1/sqrt(H)) init (PyTorch RNN style)."""
    k1, k2, k3 = jax.random.split(key, 3)
    bound = 1.0 / jnp.sqrt(jnp.float32(H))
    w_ih = jax.random.uniform(k1, (D, H), jnp.float32, -bound, bound)
    w_hh = jax.random.uniform(k2, (H, H), jnp.float32, -bound, bound)
    b = jax.random.uniform(k3, (1, H), jnp.float32, -bound, bound)
    return (w_ih, w_hh, b)


def init_hidden(batch_size, H):
    return [jnp.zeros((batch_size, H), jnp.float32),
            jnp.zeros((batch_size, H), jnp.float32)]


def _reference_bidirectional_rnn(x, m_prev, fw_params, bw_params):
    def run(xs, params, h0):
        w_ih, w_hh, b = params

        def step(h, x_t):
            h = jnp.tanh(x_t @ w_ih + h @ w_hh + b[0])
            return h, h

        hT, hs = lax.scan(step, h0, xs)
        return hs, hT

    fw_out, h_fw = run(x, fw_params, m_prev[0])
    bw_out_rev, h_bw = run(x[::-1], bw_params, m_prev[1])
    bw_out = bw_out_rev[::-1]
    return jnp.concatenate([fw_out, bw_out], axis=2), [h_fw, h_bw]


if __name__ == "__main__":
    master_key = jax.random.PRNGKey(0)

    def check(T, B, D, H, *, time_chunk=None, recurrent_dtype=None, tol=1e-2):
        kx, kfw, kbw = jax.random.split(jax.random.fold_in(master_key, 131 * T + H), 3)
        x = jax.random.normal(kx, (T, B, D), jnp.float32)
        fw_params = standard_init(kfw, D, H)
        bw_params = standard_init(kbw, D, H)
        m_prev = init_hidden(B, H)

        out, m_new = bidirectional_rnn(x, m_prev, fw_params, bw_params,
                                       time_chunk=time_chunk,
                                       recurrent_dtype=recurrent_dtype)
        out = jax.block_until_ready(out)
        m_new = [jax.block_until_ready(h) for h in m_new]

        assert out.shape == (T, B, 2 * H)
        assert m_new[0].shape == (B, H) and m_new[1].shape == (B, H)

        ref_out, ref_m = _reference_bidirectional_rnn(x, m_prev, fw_params, bw_params)
        err = max(float(jnp.max(jnp.abs(out - ref_out))),
                  float(jnp.max(jnp.abs(m_new[0] - ref_m[0]))),
                  float(jnp.max(jnp.abs(m_new[1] - ref_m[1]))))
        assert err < tol, f"mismatch vs reference (T={T}, H={H}): max abs err = {err}"

    # main config (f32 recurrence, single chunk)
    check(T=8, B=4, D=16, H=32)
    # awkward T: exercises time padding + masked updates and the multi-chunk carry
    check(T=13, B=4, D=16, H=32, time_chunk=4)
    # bf16 recurrent-matmul fast path (f32 accumulation + tanh); loose tolerance
    check(T=8, B=4, D=16, H=32, recurrent_dtype=jnp.bfloat16, tol=1e-1)

    print("KERNEL_OK")
</pallas_src>

<mosaic_0001>
module attributes {stable_mosaic.version = 11 : i64} {
  func.func @kernel(%arg0: i32, %arg1: memref<8x8x128xf32, #tpu.memory_space<vmem>>, %arg2: memref<8x8x128xf32, #tpu.memory_space<vmem>>, %arg3: memref<256x256xf32, #tpu.memory_space<vmem>>, %arg4: memref<8x256xf32, #tpu.memory_space<vmem>>, %arg5: memref<8x8x128xf32, #tpu.memory_space<vmem>>, %arg6: memref<8x8x128xf32, #tpu.memory_space<vmem>>, %arg7: memref<8x256xf32, #tpu.memory_space<vmem>>, %arg8: memref<8x256xf32, #tpu.memory_space<vmem>>) attributes {dimension_semantics = [#tpu.dimension_semantics<arbitrary>], iteration_bounds = array<i64: 1>, scalar_prefetch = 0 : i64, scratch_operands = 1 : i64, tpu.core_type = #tpu.core_type<tc>, window_params = [{transform_indices = @transform_0, window_bounds = array<i64: 8, 8, 128>}, {transform_indices = @transform_1, window_bounds = array<i64: 8, 8, 128>}, {pipeline_mode = #tpu.pipeline_mode<synchronous>, transform_indices = @transform_2, window_bounds = array<i64: 256, 256>}, {pipeline_mode = #tpu.pipeline_mode<synchronous>, transform_indices = @transform_3, window_bounds = array<i64: 8, 256>}, {transform_indices = @transform_4, window_bounds = array<i64: 8, 8, 128>}, {transform_indices = @transform_5, window_bounds = array<i64: 8, 8, 128>}, {pipeline_mode = #tpu.pipeline_mode<synchronous>, transform_indices = @transform_6, window_bounds = array<i64: 8, 256>}]} {
    %c0_i32 = arith.constant 0 : i32
    %0 = arith.cmpi eq, %arg0, %c0_i32 : i32
    %1 = arith.extui %0 : i1 to i32
    %c0_i32_0 = arith.constant 0 : i32
    %2 = arith.cmpi ne, %1, %c0_i32_0 : i32
    scf.if %2 {
      %c0_110 = arith.constant 0 : index
      %c0_111 = arith.constant 0 : index
      %192 = vector.load %arg4[%c0_110, %c0_111] : memref<8x256xf32, #tpu.memory_space<vmem>>, vector<8x256xf32>
      %c0_112 = arith.constant 0 : index
      %c0_113 = arith.constant 0 : index
      %193 = vector.load %arg8[%c0_112, %c0_113] : memref<8x256xf32, #tpu.memory_space<vmem>>, vector<8x256xf32>
      tpu.vector_store %arg8[%c0_112, %c0_113], %192 {strides = array<i32>} : memref<8x256xf32, #tpu.memory_space<vmem>>, vector<8x256xf32>,
    } else {
    }
    %c0 = arith.constant 0 : index
    %c0_1 = arith.constant 0 : index
    %3 = vector.load %arg8[%c0, %c0_1] : memref<8x256xf32, #tpu.memory_space<vmem>>, vector<8x256xf32>
    %c0_i32_2 = arith.constant 0 : i32
    %4 = arith.index_cast %c0_i32_2 : i32 to index
    %c0_3 = arith.constant 0 : index
    %c0_4 = arith.constant 0 : index
    %5 = vector.load %arg1[%4, %c0_3, %c0_4] : memref<8x8x128xf32, #tpu.memory_space<vmem>>, vector<1x8x128xf32>
    %6 = vector.shape_cast %5 : vector<1x8x128xf32> to vector<8x128xf32>
    %c7_i32 = arith.constant 7 : i32
    %7 = arith.subi %c7_i32, %c0_i32_2 : i32
    %8 = arith.index_cast %7 : i32 to index
    %c0_5 = arith.constant 0 : index
    %c0_6 = arith.constant 0 : index
    %9 = vector.load %arg2[%8, %c0_5, %c0_6] : memref<8x8x128xf32, #tpu.memory_space<vmem>>, vector<1x8x128xf32>
    %10 = vector.shape_cast %9 : vector<1x8x128xf32> to vector<8x128xf32>
    %11 = tpu.concatenate %6, %10 in 1 : vector<8x128xf32>, vector<8x128xf32> -> vector<8x256xf32>
    %c0_7 = arith.constant 0 : index
    %c0_8 = arith.constant 0 : index
    %12 = vector.load %arg3[%c0_7, %c0_8] : memref<256x256xf32, #tpu.memory_space<vmem>>, vector<256x256xf32>
    %cst = arith.constant dense<0.000000e+00> : vector<8x256xf32>
    %13 = tpu.matmul %3, %12, %cst {dimension_numbers = #tpu.dot_dimension_numbers<[1], [0], [0], [1], [0, 0, 1, 1], [], []>} : vector<8x256xf32>, vector<256x256xf32>, vector<8x256xf32> -> vector<8x256xf32>
    %14 = arith.addf %11, %13 : vector<8x256xf32>
    %15 = math.tanh %14 : vector<8x256xf32>
    %16 = vector.extract_strided_slice %15 {offsets = [0, 0], sizes = [8, 128], strides = [1, 1]} : vector<8x256xf32> to vector<8x128xf32>
    %17 = arith.index_cast %c0_i32_2 : i32 to index
    %c0_9 = arith.constant 0 : index
    %c0_10 = arith.constant 0 : index
    %18 = vector.load %arg5[%17, %c0_9, %c0_10] : memref<8x8x128xf32, #tpu.memory_space<vmem>>, vector<1x8x128xf32>
    %19 = vector.shape_cast %18 : vector<1x8x128xf32> to vector<8x128xf32>
    %20 = vector.shape_cast %16 : vector<8x128xf32> to vector<1x8x128xf32>
    tpu.vector_store %arg5[%17, %c0_9, %c0_10], %20 {strides = array<i32>} : memref<8x8x128xf32, #tpu.memory_space<vmem>>, vector<1x8x128xf32>,
    %21 = vector.extract_strided_slice %15 {offsets = [0, 128], sizes = [8, 128], strides = [1, 1]} : vector<8x256xf32> to vector<8x128xf32>
    %c7_i32_11 = arith.constant 7 : i32
    %22 = arith.subi %c7_i32_11, %c0_i32_2 : i32
    %23 = arith.index_cast %22 : i32 to index
    %c0_12 = arith.constant 0 : index
    %c0_13 = arith.constant 0 : index
    %24 = vector.load %arg6[%23, %c0_12, %c0_13] : memref<8x8x128xf32, #tpu.memory_space<vmem>>, vector<1x8x128xf32>
    %25 = vector.shape_cast %24 : vector<1x8x128xf32> to vector<8x128xf32>
    %26 = vector.shape_cast %21 : vector<8x128xf32> to vector<1x8x128xf32>
    tpu.vector_store %arg6[%23, %c0_12, %c0_13], %26 {strides = array<i32>} : memref<8x8x128xf32, #tpu.memory_space<vmem>>, vector<1x8x128xf32>,
    %c1_i32 = arith.constant 1 : i32
    %27 = arith.index_cast %c1_i32 : i32 to index
    %c0_14 = arith.constant 0 : index
    %c0_15 = arith.constant 0 : index
    %28 = vector.load %arg1[%27, %c0_14, %c0_15] : memref<8x8x128xf32, #tpu.memory_space<vmem>>, vector<1x8x128xf32>
    %29 = vector.shape_cast %28 : vector<1x8x128xf32> to vector<8x128xf32>
    %c7_i32_16 = arith.constant 7 : i32
    %30 = arith.subi %c7_i32_16, %c1_i32 : i32
    %31 = arith.index_cast %30 : i32 to index
    %c0_17 = arith.constant 0 : index
    %c0_18 = arith.constant 0 : index
    %32 = vector.load %arg2[%31, %c0_17, %c0_18] : memref<8x8x128xf32, #tpu.memory_space<vmem>>, vector<1x8x128xf32>
    %33 = vector.shape_cast %32 : vector<1x8x128xf32> to vector<8x128xf32>
    %34 = tpu.concatenate %29, %33 in 1 : vector<8x128xf32>, vector<8x128xf32> -> vector<8x256xf32>
    %c0_19 = arith.constant 0 : index
    %c0_20 = arith.constant 0 : index
    %35 = vector.load %arg3[%c0_19, %c0_20] : memref<256x256xf32, #tpu.memory_space<vmem>>, vector<256x256xf32>
    %cst_21 = arith.constant dense<0.000000e+00> : vector<8x256xf32>
    %36 = tpu.matmul %15, %35, %cst_21 {dimension_numbers = #tpu.dot_dimension_numbers<[1], [0], [0], [1], [0, 0, 1, 1], [], []>} : vector<8x256xf32>, vector<256x256xf32>, vector<8x256xf32> -> vector<8x256xf32>
    %37 = arith.addf %34, %36 : vector<8x256xf32>
    %38 = math.tanh %37 : vector<8x256xf32>
    %39 = vector.extract_strided_slice %38 {offsets = [0, 0], sizes = [8, 128], strides = [1, 1]} : vector<8x256xf32> to vector<8x128xf32>
    %40 = arith.index_cast %c1_i32 : i32 to index
    %c0_22 = arith.constant 0 : index
    %c0_23 = arith.constant 0 : index
    %41 = vector.load %arg5[%40, %c0_22, %c0_23] : memref<8x8x128xf32, #tpu.memory_space<vmem>>, vector<1x8x128xf32>
    %42 = vector.shape_cast %41 : vector<1x8x128xf32> to vector<8x128xf32>
    %43 = vector.shape_cast %39 : vector<8x128xf32> to vector<1x8x128xf32>
    tpu.vector_store %arg5[%40, %c0_22, %c0_23], %43 {strides = array<i32>} : memref<8x8x128xf32, #tpu.memory_space<vmem>>, vector<1x8x128xf32>,
    %44 = vector.extract_strided_slice %38 {offsets = [0, 128], sizes = [8, 128], strides = [1, 1]} : vector<8x256xf32> to vector<8x128xf32>
    %c7_i32_24 = arith.constant 7 : i32
    %45 = arith.subi %c7_i32_24, %c1_i32 : i32
    %46 = arith.index_cast %45 : i32 to index
    %c0_25 = arith.constant 0 : index
    %c0_26 = arith.constant 0 : index
    %47 = vector.load %arg6[%46, %c0_25, %c0_26] : memref<8x8x128xf32, #tpu.memory_space<vmem>>, vector<1x8x128xf32>
    %48 = vector.shape_cast %47 : vector<1x8x128xf32> to vector<8x128xf32>
    %49 = vector.shape_cast %44 : vector<8x128xf32> to vector<1x8x128xf32>
    tpu.vector_store %arg6[%46, %c0_25, %c0_26], %49 {strides = array<i32>} : memref<8x8x128xf32, #tpu.memory_space<vmem>>, vector<1x8x128xf32>,
    %c2_i32 = arith.constant 2 : i32
    %50 = arith.index_cast %c2_i32 : i32 to index
    %c0_27 = arith.constant 0 : index
    %c0_28 = arith.constant 0 : index
    %51 = vector.load %arg1[%50, %c0_27, %c0_28] : memref<8x8x128xf32, #tpu.memory_space<vmem>>, vector<1x8x128xf32>
    %52 = vector.shape_cast %51 : vector<1x8x128xf32> to vector<8x128xf32>
    %c7_i32_29 = arith.constant 7 : i32
    %53 = arith.subi %c7_i32_29, %c2_i32 : i32
    %54 = arith.index_cast %53 : i32 to index
    %c0_30 = arith.constant 0 : index
    %c0_31 = arith.constant 0 : index
    %55 = vector.load %arg2[%54, %c0_30, %c0_31] : memref<8x8x128xf32, #tpu.memory_space<vmem>>, vector<1x8x128xf32>
    %56 = vector.shape_cast %55 : vector<1x8x128xf32> to vector<8x128xf32>
    %57 = tpu.concatenate %52, %56 in 1 : vector<8x128xf32>, vector<8x128xf32> -> vector<8x256xf32>
    %c0_32 = arith.constant 0 : index
    %c0_33 = arith.constant 0 : index
    %58 = vector.load %arg3[%c0_32, %c0_33] : memref<256x256xf32, #tpu.memory_space<vmem>>, vector<256x256xf32>
    %cst_34 = arith.constant dense<0.000000e+00> : vector<8x256xf32>
    %59 = tpu.matmul %38, %58, %cst_34 {dimension_numbers = #tpu.dot_dimension_numbers<[1], [0], [0], [1], [0, 0, 1, 1], [], []>} : vector<8x256xf32>, vector<256x256xf32>, vector<8x256xf32> -> vector<8x256xf32>
    %60 = arith.addf %57, %59 : vector<8x256xf32>
    %61 = math.tanh %60 : vector<8x256xf32>
    %62 = vector.extract_strided_slice %61 {offsets = [0, 0], sizes = [8, 128], strides = [1, 1]} : vector<8x256xf32> to vector<8x128xf32>
    %63 = arith.index_cast %c2_i32 : i32 to index
    %c0_35 = arith.constant 0 : index
    %c0_36 = arith.constant 0 : index
    %64 = vector.load %arg5[%63, %c0_35, %c0_36] : memref<8x8x128xf32, #tpu.memory_space<vmem>>, vector<1x8x128xf32>
    %65 = vector.shape_cast %64 : vector<1x8x128xf32> to vector<8x128xf32>
    %66 = vector.shape_cast %62 : vector<8x128xf32> to vector<1x8x128xf32>
    tpu.vector_store %arg5[%63, %c0_35, %c0_36], %66 {strides = array<i32>} : memref<8x8x128xf32, #tpu.memory_space<vmem>>, vector<1x8x128xf32>,
    %67 = vector.extract_strided_slice %61 {offsets = [0, 128], sizes = [8, 128], strides = [1, 1]} : vector<8x256xf32> to vector<8x128xf32>
    %c7_i32_37 = arith.constant 7 : i32
    %68 = arith.subi %c7_i32_37, %c2_i32 : i32
    %69 = arith.index_cast %68 : i32 to index
    %c0_38 = arith.constant 0 : index
    %c0_39 = arith.constant 0 : index
    %70 = vector.load %arg6[%69, %c0_38, %c0_39] : memref<8x8x128xf32, #tpu.memory_space<vmem>>, vector<1x8x128xf32>
    %71 = vector.shape_cast %70 : vector<1x8x128xf32> to vector<8x128xf32>
    %72 = vector.shape_cast %67 : vector<8x128xf32> to vector<1x8x128xf32>
    tpu.vector_store %arg6[%69, %c0_38, %c0_39], %72 {strides = array<i32>} : memref<8x8x128xf32, #tpu.memory_space<vmem>>, vector<1x8x128xf32>,
    %c3_i32 = arith.constant 3 : i32
    %73 = arith.index_cast %c3_i32 : i32 to index
    %c0_40 = arith.constant 0 : index
    %c0_41 = arith.constant 0 : index
    %74 = vector.load %arg1[%73, %c0_40, %c0_41] : memref<8x8x128xf32, #tpu.memory_space<vmem>>, vector<1x8x128xf32>
    %75 = vector.shape_cast %74 : vector<1x8x128xf32> to vector<8x128xf32>
    %c7_i32_42 = arith.constant 7 : i32
    %76 = arith.subi %c7_i32_42, %c3_i32 : i32
    %77 = arith.index_cast %76 : i32 to index
    %c0_43 = arith.constant 0 : index
    %c0_44 = arith.constant 0 : index
    %78 = vector.load %arg2[%77, %c0_43, %c0_44] : memref<8x8x128xf32, #tpu.memory_space<vmem>>, vector<1x8x128xf32>
    %79 = vector.shape_cast %78 : vector<1x8x128xf32> to vector<8x128xf32>
    %80 = tpu.concatenate %75, %79 in 1 : vector<8x128xf32>, vector<8x128xf32> -> vector<8x256xf32>
    %c0_45 = arith.constant 0 : index
    %c0_46 = arith.constant 0 : index
    %81 = vector.load %arg3[%c0_45, %c0_46] : memref<256x256xf32, #tpu.memory_space<vmem>>, vector<256x256xf32>
    %cst_47 = arith.constant dense<0.000000e+00> : vector<8x256xf32>
    %82 = tpu.matmul %61, %81, %cst_47 {dimension_numbers = #tpu.dot_dimension_numbers<[1], [0], [0], [1], [0, 0, 1, 1], [], []>} : vector<8x256xf32>, vector<256x256xf32>, vector<8x256xf32> -> vector<8x256xf32>
    %83 = arith.addf %80, %82 : vector<8x256xf32>
    %84 = math.tanh %83 : vector<8x256xf32>
    %85 = vector.extract_strided_slice %84 {offsets = [0, 0], sizes = [8, 128], strides = [1, 1]} : vector<8x256xf32> to vector<8x128xf32>
    %86 = arith.index_cast %c3_i32 : i32 to index
    %c0_48 = arith.constant 0 : index
    %c0_49 = arith.constant 0 : index
    %87 = vector.load %arg5[%86, %c0_48, %c0_49] : memref<8x8x128xf32, #tpu.memory_space<vmem>>, vector<1x8x128xf32>
    %88 = vector.shape_cast %87 : vector<1x8x128xf32> to vector<8x128xf32>
    %89 = vector.shape_cast %85 : vector<8x128xf32> to vector<1x8x128xf32>
    tpu.vector_store %arg5[%86, %c0_48, %c0_49], %89 {strides = array<i32>} : memref<8x8x128xf32, #tpu.memory_space<vmem>>, vector<1x8x128xf32>,
    %90 = vector.extract_strided_slice %84 {offsets = [0, 128], sizes = [8, 128], strides = [1, 1]} : vector<8x256xf32> to vector<8x128xf32>
    %c7_i32_50 = arith.constant 7 : i32
    %91 = arith.subi %c7_i32_50, %c3_i32 : i32
    %92 = arith.index_cast %91 : i32 to index
    %c0_51 = arith.constant 0 : index
    %c0_52 = arith.constant 0 : index
    %93 = vector.load %arg6[%92, %c0_51, %c0_52] : memref<8x8x128xf32, #tpu.memory_space<vmem>>, vector<1x8x128xf32>
    %94 = vector.shape_cast %93 : vector<1x8x128xf32> to vector<8x128xf32>
    %95 = vector.shape_cast %90 : vector<8x128xf32> to vector<1x8x128xf32>
    tpu.vector_store %arg6[%92, %c0_51, %c0_52], %95 {strides = array<i32>} : memref<8x8x128xf32, #tpu.memory_space<vmem>>, vector<1x8x128xf32>,
    %c4_i32 = arith.constant 4 : i32
    %96 = arith.index_cast %c4_i32 : i32 to index
    %c0_53 = arith.constant 0 : index
    %c0_54 = arith.constant 0 : index
    %97 = vector.load %arg1[%96, %c0_53, %c0_54] : memref<8x8x128xf32, #tpu.memory_space<vmem>>, vector<1x8x128xf32>
    %98 = vector.shape_cast %97 : vector<1x8x128xf32> to vector<8x128xf32>
    %c7_i32_55 = arith.constant 7 : i32
    %99 = arith.subi %c7_i32_55, %c4_i32 : i32
    %100 = arith.index_cast %99 : i32 to index
    %c0_56 = arith.constant 0 : index
    %c0_57 = arith.constant 0 : index
    %101 = vector.load %arg2[%100, %c0_56, %c0_57] : memref<8x8x128xf32, #tpu.memory_space<vmem>>, vector<1x8x128xf32>
    %102 = vector.shape_cast %101 : vector<1x8x128xf32> to vector<8x128xf32>
    %103 = tpu.concatenate %98, %102 in 1 : vector<8x128xf32>, vector<8x128xf32> -> vector<8x256xf32>
    %c0_58 = arith.constant 0 : index
    %c0_59 = arith.constant 0 : index
    %104 = vector.load %arg3[%c0_58, %c0_59] : memref<256x256xf32, #tpu.memory_space<vmem>>, vector<256x256xf32>
    %cst_60 = arith.constant dense<0.000000e+00> : vector<8x256xf32>
    %105 = tpu.matmul %84, %104, %cst_60 {dimension_numbers = #tpu.dot_dimension_numbers<[1], [0], [0], [1], [0, 0, 1, 1], [], []>} : vector<8x256xf32>, vector<256x256xf32>, vector<8x256xf32> -> vector<8x256xf32>
    %106 = arith.addf %103, %105 : vector<8x256xf32>
    %107 = math.tanh %106 : vector<8x256xf32>
    %108 = vector.extract_strided_slice %107 {offsets = [0, 0], sizes = [8, 128], strides = [1, 1]} : vector<8x256xf32> to vector<8x128xf32>
    %109 = arith.index_cast %c4_i32 : i32 to index
    %c0_61 = arith.constant 0 : index
    %c0_62 = arith.constant 0 : index
    %110 = vector.load %arg5[%109, %c0_61, %c0_62] : memref<8x8x128xf32, #tpu.memory_space<vmem>>, vector<1x8x128xf32>
    %111 = vector.shape_cast %110 : vector<1x8x128xf32> to vector<8x128xf32>
    %112 = vector.shape_cast %108 : vector<8x128xf32> to vector<1x8x128xf32>
    tpu.vector_store %arg5[%109, %c0_61, %c0_62], %112 {strides = array<i32>} : memref<8x8x128xf32, #tpu.memory_space<vmem>>, vector<1x8x128xf32>,
    %113 = vector.extract_strided_slice %107 {offsets = [0, 128], sizes = [8, 128], strides = [1, 1]} : vector<8x256xf32> to vector<8x128xf32>
    %c7_i32_63 = arith.constant 7 : i32
    %114 = arith.subi %c7_i32_63, %c4_i32 : i32
    %115 = arith.index_cast %114 : i32 to index
    %c0_64 = arith.constant 0 : index
    %c0_65 = arith.constant 0 : index
    %116 = vector.load %arg6[%115, %c0_64, %c0_65] : memref<8x8x128xf32, #tpu.memory_space<vmem>>, vector<1x8x128xf32>
    %117 = vector.shape_cast %116 : vector<1x8x128xf32> to vector<8x128xf32>
    %118 = vector.shape_cast %113 : vector<8x128xf32> to vector<1x8x128xf32>
    tpu.vector_store %arg6[%115, %c0_64, %c0_65], %118 {strides = array<i32>} : memref<8x8x128xf32, #tpu.memory_space<vmem>>, vector<1x8x128xf32>,
    %c5_i32 = arith.constant 5 : i32
    %119 = arith.index_cast %c5_i32 : i32 to index
    %c0_66 = arith.constant 0 : index
    %c0_67 = arith.constant 0 : index
    %120 = vector.load %arg1[%119, %c0_66, %c0_67] : memref<8x8x128xf32, #tpu.memory_space<vmem>>, vector<1x8x128xf32>
    %121 = vector.shape_cast %120 : vector<1x8x128xf32> to vector<8x128xf32>
    %c7_i32_68 = arith.constant 7 : i32
    %122 = arith.subi %c7_i32_68, %c5_i32 : i32
    %123 = arith.index_cast %122 : i32 to index
    %c0_69 = arith.constant 0 : index
    %c0_70 = arith.constant 0 : index
    %124 = vector.load %arg2[%123, %c0_69, %c0_70] : memref<8x8x128xf32, #tpu.memory_space<vmem>>, vector<1x8x128xf32>
    %125 = vector.shape_cast %124 : vector<1x8x128xf32> to vector<8x128xf32>
    %126 = tpu.concatenate %121, %125 in 1 : vector<8x128xf32>, vector<8x128xf32> -> vector<8x256xf32>
    %c0_71 = arith.constant 0 : index
    %c0_72 = arith.constant 0 : index
    %127 = vector.load %arg3[%c0_71, %c0_72] : memref<256x256xf32, #tpu.memory_space<vmem>>, vector<256x256xf32>
    %cst_73 = arith.constant dense<0.000000e+00> : vector<8x256xf32>
    %128 = tpu.matmul %107, %127, %cst_73 {dimension_numbers = #tpu.dot_dimension_numbers<[1], [0], [0], [1], [0, 0, 1, 1], [], []>} : vector<8x256xf32>, vector<256x256xf32>, vector<8x256xf32> -> vector<8x256xf32>
    %129 = arith.addf %126, %128 : vector<8x256xf32>
    %130 = math.tanh %129 : vector<8x256xf32>
    %131 = vector.extract_strided_slice %130 {offsets = [0, 0], sizes = [8, 128], strides = [1, 1]} : vector<8x256xf32> to vector<8x128xf32>
    %132 = arith.index_cast %c5_i32 : i32 to index
    %c0_74 = arith.constant 0 : index
    %c0_75 = arith.constant 0 : index
    %133 = vector.load %arg5[%132, %c0_74, %c0_75] : memref<8x8x128xf32, #tpu.memory_space<vmem>>, vector<1x8x128xf32>
    %134 = vector.shape_cast %133 : vector<1x8x128xf32> to vector<8x128xf32>
    %135 = vector.shape_cast %131 : vector<8x128xf32> to vector<1x8x128xf32>
    tpu.vector_store %arg5[%132, %c0_74, %c0_75], %135 {strides = array<i32>} : memref<8x8x128xf32, #tpu.memory_space<vmem>>, vector<1x8x128xf32>,
    %136 = vector.extract_strided_slice %130 {offsets = [0, 128], sizes = [8, 128], strides = [1, 1]} : vector<8x256xf32> to vector<8x128xf32>
    %c7_i32_76 = arith.constant 7 : i32
    %137 = arith.subi %c7_i32_76, %c5_i32 : i32
    %138 = arith.index_cast %137 : i32 to index
    %c0_77 = arith.constant 0 : index
    %c0_78 = arith.constant 0 : index
    %139 = vector.load %arg6[%138, %c0_77, %c0_78] : memref<8x8x128xf32, #tpu.memory_space<vmem>>, vector<1x8x128xf32>
    %140 = vector.shape_cast %139 : vector<1x8x128xf32> to vector<8x128xf32>
    %141 = vector.shape_cast %136 : vector<8x128xf32> to vector<1x8x128xf32>
    tpu.vector_store %arg6[%138, %c0_77, %c0_78], %141 {strides = array<i32>} : memref<8x8x128xf32, #tpu.memory_space<vmem>>, vector<1x8x128xf32>,
    %c6_i32 = arith.constant 6 : i32
    %142 = arith.index_cast %c6_i32 : i32 to index
    %c0_79 = arith.constant 0 : index
    %c0_80 = arith.constant 0 : index
    %143 = vector.load %arg1[%142, %c0_79, %c0_80] : memref<8x8x128xf32, #tpu.memory_space<vmem>>, vector<1x8x128xf32>
    %144 = vector.shape_cast %143 : vector<1x8x128xf32> to vector<8x128xf32>
    %c7_i32_81 = arith.constant 7 : i32
    %145 = arith.subi %c7_i32_81, %c6_i32 : i32
    %146 = arith.index_cast %145 : i32 to index
    %c0_82 = arith.constant 0 : index
    %c0_83 = arith.constant 0 : index
    %147 = vector.load %arg2[%146, %c0_82, %c0_83] : memref<8x8x128xf32, #tpu.memory_space<vmem>>, vector<1x8x128xf32>
    %148 = vector.shape_cast %147 : vector<1x8x128xf32> to vector<8x128xf32>
    %149 = tpu.concatenate %144, %148 in 1 : vector<8x128xf32>, vector<8x128xf32> -> vector<8x256xf32>
    %c0_84 = arith.constant 0 : index
    %c0_85 = arith.constant 0 : index
    %150 = vector.load %arg3[%c0_84, %c0_85] : memref<256x256xf32, #tpu.memory_space<vmem>>, vector<256x256xf32>
    %cst_86 = arith.constant dense<0.000000e+00> : vector<8x256xf32>
    %151 = tpu.matmul %130, %150, %cst_86 {dimension_numbers = #tpu.dot_dimension_numbers<[1], [0], [0], [1], [0, 0, 1, 1], [], []>} : vector<8x256xf32>, vector<256x256xf32>, vector<8x256xf32> -> vector<8x256xf32>
    %152 = arith.addf %149, %151 : vector<8x256xf32>
    %153 = math.tanh %152 : vector<8x256xf32>
    %154 = vector.extract_strided_slice %153 {offsets = [0, 0], sizes = [8, 128], strides = [1, 1]} : vector<8x256xf32> to vector<8x128xf32>
    %155 = arith.index_cast %c6_i32 : i32 to index
    %c0_87 = arith.constant 0 : index
    %c0_88 = arith.constant 0 : index
    %156 = vector.load %arg5[%155, %c0_87, %c0_88] : memref<8x8x128xf32, #tpu.memory_space<vmem>>, vector<1x8x128xf32>
    %157 = vector.shape_cast %156 : vector<1x8x128xf32> to vector<8x128xf32>
    %158 = vector.shape_cast %154 : vector<8x128xf32> to vector<1x8x128xf32>
    tpu.vector_store %arg5[%155, %c0_87, %c0_88], %158 {strides = array<i32>} : memref<8x8x128xf32, #tpu.memory_space<vmem>>, vector<1x8x128xf32>,
    %159 = vector.extract_strided_slice %153 {offsets = [0, 128], sizes = [8, 128], strides = [1, 1]} : vector<8x256xf32> to vector<8x128xf32>
    %c7_i32_89 = arith.constant 7 : i32
    %160 = arith.subi %c7_i32_89, %c6_i32 : i32
    %161 = arith.index_cast %160 : i32 to index
    %c0_90 = arith.constant 0 : index
    %c0_91 = arith.constant 0 : index
    %162 = vector.load %arg6[%161, %c0_90, %c0_91] : memref<8x8x128xf32, #tpu.memory_space<vmem>>, vector<1x8x128xf32>
    %163 = vector.shape_cast %162 : vector<1x8x128xf32> to vector<8x128xf32>
    %164 = vector.shape_cast %159 : vector<8x128xf32> to vector<1x8x128xf32>
    tpu.vector_store %arg6[%161, %c0_90, %c0_91], %164 {strides = array<i32>} : memref<8x8x128xf32, #tpu.memory_space<vmem>>, vector<1x8x128xf32>,
    %c7_i32_92 = arith.constant 7 : i32
    %165 = arith.index_cast %c7_i32_92 : i32 to index
    %c0_93 = arith.constant 0 : index
    %c0_94 = arith.constant 0 : index
    %166 = vector.load %arg1[%165, %c0_93, %c0_94] : memref<8x8x128xf32, #tpu.memory_space<vmem>>, vector<1x8x128xf32>
    %167 = vector.shape_cast %166 : vector<1x8x128xf32> to vector<8x128xf32>
    %c7_i32_95 = arith.constant 7 : i32
    %168 = arith.subi %c7_i32_95, %c7_i32_92 : i32
    %169 = arith.index_cast %168 : i32 to index
    %c0_96 = arith.constant 0 : index
    %c0_97 = arith.constant 0 : index
    %170 = vector.load %arg2[%169, %c0_96, %c0_97] : memref<8x8x128xf32, #tpu.memory_space<vmem>>, vector<1x8x128xf32>
    %171 = vector.shape_cast %170 : vector<1x8x128xf32> to vector<8x128xf32>
    %172 = tpu.concatenate %167, %171 in 1 : vector<8x128xf32>, vector<8x128xf32> -> vector<8x256xf32>
    %c0_98 = arith.constant 0 : index
    %c0_99 = arith.constant 0 : index
    %173 = vector.load %arg3[%c0_98, %c0_99] : memref<256x256xf32, #tpu.memory_space<vmem>>, vector<256x256xf32>
    %cst_100 = arith.constant dense<0.000000e+00> : vector<8x256xf32>
    %174 = tpu.matmul %153, %173, %cst_100 {dimension_numbers = #tpu.dot_dimension_numbers<[1], [0], [0], [1], [0, 0, 1, 1], [], []>} : vector<8x256xf32>, vector<256x256xf32>, vector<8x256xf32> -> vector<8x256xf32>
    %175 = arith.addf %172, %174 : vector<8x256xf32>
    %176 = math.tanh %175 : vector<8x256xf32>
    %177 = vector.extract_strided_slice %176 {offsets = [0, 0], sizes = [8, 128], strides = [1, 1]} : vector<8x256xf32> to vector<8x128xf32>
    %178 = arith.index_cast %c7_i32_92 : i32 to index
    %c0_101 = arith.constant 0 : index
    %c0_102 = arith.constant 0 : index
    %179 = vector.load %arg5[%178, %c0_101, %c0_102] : memref<8x8x128xf32, #tpu.memory_space<vmem>>, vector<1x8x128xf32>
    %180 = vector.shape_cast %179 : vector<1x8x128xf32> to vector<8x128xf32>
    %181 = vector.shape_cast %177 : vector<8x128xf32> to vector<1x8x128xf32>
    tpu.vector_store %arg5[%178, %c0_101, %c0_102], %181 {strides = array<i32>} : memref<8x8x128xf32, #tpu.memory_space<vmem>>, vector<1x8x128xf32>,
    %182 = vector.extract_strided_slice %176 {offsets = [0, 128], sizes = [8, 128], strides = [1, 1]} : vector<8x256xf32> to vector<8x128xf32>
    %c7_i32_103 = arith.constant 7 : i32
    %183 = arith.subi %c7_i32_103, %c7_i32_92 : i32
    %184 = arith.index_cast %183 : i32 to index
    %c0_104 = arith.constant 0 : index
    %c0_105 = arith.constant 0 : index
    %185 = vector.load %arg6[%184, %c0_104, %c0_105] : memref<8x8x128xf32, #tpu.memory_space<vmem>>, vector<1x8x128xf32>
    %186 = vector.shape_cast %185 : vector<1x8x128xf32> to vector<8x128xf32>
    %187 = vector.shape_cast %182 : vector<8x128xf32> to vector<1x8x128xf32>
    tpu.vector_store %arg6[%184, %c0_104, %c0_105], %187 {strides = array<i32>} : memref<8x8x128xf32, #tpu.memory_space<vmem>>, vector<1x8x128xf32>,
    %c8_i32 = arith.constant 8 : i32
    %c0_106 = arith.constant 0 : index
    %c0_107 = arith.constant 0 : index
    %188 = vector.load %arg8[%c0_106, %c0_107] : memref<8x256xf32, #tpu.memory_space<vmem>>, vector<8x256xf32>
    tpu.vector_store %arg8[%c0_106, %c0_107], %176 {strides = array<i32>} : memref<8x256xf32, #tpu.memory_space<vmem>>, vector<8x256xf32>,
    %c0_i32_108 = arith.constant 0 : i32
    %189 = arith.cmpi eq, %arg0, %c0_i32_108 : i32
    %190 = arith.extui %189 : i1 to i32
    %c0_i32_109 = arith.constant 0 : i32
    %191 = arith.cmpi ne, %190, %c0_i32_109 : i32
    scf.if %191 {
      %c0_110 = arith.constant 0 : index
      %c0_111 = arith.constant 0 : index
      %192 = vector.load %arg7[%c0_110, %c0_111] : memref<8x256xf32, #tpu.memory_space<vmem>>, vector<8x256xf32>
      tpu.vector_store %arg7[%c0_110, %c0_111], %176 {strides = array<i32>} : memref<8x256xf32, #tpu.memory_space<vmem>>, vector<8x256xf32>,
    } else {
    }
    return
  }
  func.func @transform_0(%arg0: i32) -> (i32, i32, i32) {
    %c0_i32 = arith.constant 0 : i32
    %c0_i32_0 = arith.constant 0 : i32
    %c0_i32_1 = arith.constant 0 : i32
    return %arg0, %c0_i32, %c0_i32_0 : i32, i32, i32
  }
  func.func @transform_1(%arg0: i32) -> (i32, i32, i32) {
    %c0_i32 = arith.constant 0 : i32
    %0 = arith.subi %c0_i32, %arg0 : i32
    %c0_i32_0 = arith.constant 0 : i32
    %c1_i32 = arith.constant 1 : i32
    %c0_i32_1 = arith.constant 0 : i32
    return %0, %c0_i32_0, %c1_i32 : i32, i32, i32
  }
  func.func @transform_2(%arg0: i32) -> (i32, i32) {
    %c0_i32 = arith.constant 0 : i32
    %c0_i32_0 = arith.constant 0 : i32
    %c0_i32_1 = arith.constant 0 : i32
    return %c0_i32, %c0_i32_0 : i32, i32
  }
  func.func @transform_3(%arg0: i32) -> (i32, i32) {
    %c0_i32 = arith.constant 0 : i32
    %c0_i32_0 = arith.constant 0 : i32
    %c0_i32_1 = arith.constant 0 : i32
    return %c0_i32, %c0_i32_0 : i32, i32
  }
  func.func @transform_4(%arg0: i32) -> (i32, i32, i32) {
    %c0_i32 = arith.constant 0 : i32
    %c0_i32_0 = arith.constant 0 : i32
    %c0_i32_1 = arith.constant 0 : i32
    return %arg0, %c0_i32, %c0_i32_0 : i32, i32, i32
  }
  func.func @transform_5(%arg0: i32) -> (i32, i32, i32) {
    %c0_i32 = arith.constant 0 : i32
    %0 = arith.subi %c0_i32, %arg0 : i32
    %c0_i32_0 = arith.constant 0 : i32
    %c0_i32_1 = arith.constant 0 : i32
    %c0_i32_2 = arith.constant 0 : i32
    return %0, %c0_i32_0, %c0_i32_1 : i32, i32, i32
  }
  func.func @transform_6(%arg0: i32) -> (i32, i32) {
    %c0_i32 = arith.constant 0 : i32
    %c0_i32_0 = arith.constant 0 : i32
    %c0_i32_1 = arith.constant 0 : i32
    return %c0_i32, %c0_i32_0 : i32, i32
  }
}

</mosaic_0001>

<bundles_post_ra>
// kernel: tpu_custom_call.1
= control target key start
LH: loop header
LB: loop body
LE: loop exit
PB: predicated region body
PF: predicated region fallthrough
CT: control target
= control target key end

     0   :  { %12 = vsyncpa [#allocation4], 0  ;;  %s2484_s0 = inlined_call_operand.hbm [shape: f32[8,8,256], index: 0, kind: input, shape index: {}]   ;;  %s2485_s1 = inlined_call_operand.hbm [shape: f32[8,8,256], index: 1, kind: input, shape index: {}]   ;;  %s2486_s2 = inlined_call_operand.hbm [shape: f32[256,256], index: 2, kind: input, shape index: {}]   ;;  %s2487_s3 = inlined_call_operand.hbm [shape: f32[8,256], index: 3, kind: input, shape index: {}]   ;;  %s2488_s4 = inlined_call_operand.hbm [shape: f32[8,8,128], index: 4, kind: output, shape index: {0}]   ;;  %s2489_s5 = inlined_call_operand.hbm [shape: f32[8,8,128], index: 5, kind: output, shape index: {1}]   ;;  %s2490_s6 = inlined_call_operand.hbm [shape: f32[8,256], index: 6, kind: output, shape index: {2}]  }
   0x1   :  { %13 = vsyncpa [#allocation7], 0 }
   0x2   :  { %14 = vsyncpa [#allocation10], 0 }
   0x3   :  { %15 = vsyncpa [#allocation5], 0 }
   0x4   :  { %16 = vsyncpa [#allocation13], 0  ;;  %s1415_s23 = scalar_lea.hbm %s2485_s1, 8  ;;  %s1639_s25 = smov [#allocation6]  }
   0x5   :  { %s40_s24 = sshll.u32 %s1415_s23, 4  ;;  %s42_s26 = sshll.u32 %s1639_s25, 4  ;;  %s41_s24 = int_to_ptr.hbm [resolvable:$true] %s40_s24  ;;  %s43_s26 = int_to_ptr.vmem [resolvable:$true] %s42_s26 }
   0x6   :  { %s21_s29 = sshll.u32 %s2484_s0, 4  ;;  %s1640_s30 = smov 256   ;;  %s22_s29 = int_to_ptr.hbm [resolvable:$true] %s21_s29 }
   0x7   :  { %s1641_s7 = smov 128   ;;  %s1642_s8 = smov 8  }
   0x8   :  { %48 = dma.hbm_to_vmem [thread:$0]  %s41_s24, 1024, %s43_s26, [#allocation7], %s1640_s30, %s1641_s7, %s1642_s8  }
   0x9   :  { %s1643_s9 = smov [#allocation3]   ;;  %s53_s12 = sshll.u32 %s2486_s2, 4  ;;  %s54_s12 = int_to_ptr.hbm [resolvable:$true] %s53_s12 }
   0xa   :  { %s23_s10 = sshll.u32 %s1643_s9, 4  ;;  %s1644_s13 = smov [#allocation8]   ;;  %s24_s10 = int_to_ptr.vmem [resolvable:$true] %s23_s10 }
   0xb   :  { %29 = dma.hbm_to_vmem [thread:$0]  %s22_s29, 1024, %s24_s10, [#allocation4], %s1640_s30, %s1641_s7, %s1642_s8  }
   0xc   :  { %s55_s0 = sshll.u32 %s1644_s13, 4  ;;  %s67_s16 = sshll.u32 %s2487_s3, 4  ;;  %s56_s0 = int_to_ptr.vmem [resolvable:$true] %s55_s0  ;;  %s68_s16 = int_to_ptr.hbm [resolvable:$true] %s67_s16 }
   0xd   :  { %s1645_s17 = smov 16   ;;  %s1646_s18 = smov [#allocation9]  }
   0xe   :  { %61 = dma.hbm_to_vmem [thread:$0]  %s54_s12, 8192, %s56_s0, [#allocation7], %s1640_s30, %s1640_s30, %s1645_s17  }
   0xf   :  { %s69_s19 = sshll.u32 %s1646_s18, 4  ;;  %s70_s19 = int_to_ptr.vmem [resolvable:$true] %s69_s19 }
  0x10   :  { %72 = dma.hbm_to_vmem [thread:$0]  %s68_s16, 256, %s70_s19, [#allocation10]  }
  0x11   :  { %1629 = dma.done.wait [#allocation4], 1024  }
  0x12   :  { %1630 = vsyncadd [#allocation4], 4294966272 }
  0x13   :  { %1631 = dma.done.wait [#allocation7], 9216  }
  0x14   :  { %1632 = vsyncadd [#allocation7], 4294958080 }
  0x15   :  { %1633 = dma.done.wait [#allocation10], 256  }
  0x16   :  { %1634 = vsyncadd [#allocation10], 4294967040  ;;  %v1701_v0 = vld [vmem:[#allocation8 + $0xf8] sm:$0xff]  ;;  %v1705_v2 = vld [vmem:[#allocation8 + $0xe8] sm:$0xff]  ;;  %s1647_s2 = smov [#allocation11]   ;;  %s1360_s22 = sshll.u32 %s2488_s4, 4  ;;  %s1361_s22 = int_to_ptr.hbm [resolvable:$true] %s1360_s22 }
  0x17   :  { %v1703_v1 = vld [vmem:[#allocation8 + $0x1f8] sm:$0xff]  ;;  %210 = vmatpush.msra.mxu2 %v1701_v0  ;;  %v1709_v3 = vld [vmem:[#allocation8 + $0x1e8] sm:$0xff]  ;;  %v1715_v6 = vld [vmem:[#allocation8 + $0xf0] sm:$0xff]  ;;  %s1358_s3 = sshll.u32 %s1647_s2, 4  ;;  %s1648_s23 = smov [#allocation12]   ;;  %s1359_s3 = int_to_ptr.vmem [resolvable:$true] %s1358_s3 }
  0x18   :  { %230 = vmatpush.msra.mxu3 %v1703_v1  ;;  %v1711_v4 = vld [vmem:[#allocation8 + $0xd8] sm:$0xff]  ;;  %v1717_v7 = vld [vmem:[#allocation8 + $0x1f0] sm:$0xff]  ;;  %v1721_v8 = vld [vmem:[#allocation8 + $0xe0] sm:$0xff]  ;;  %170 = vmatpush.msra.mxu0 %v1715_v6  ;;  %s1375_s24 = sshll.u32 %s1648_s23, 4  ;;  %s1377_s27 = sshll.u32 %s2489_s5, 4  ;;  %s1376_s24 = int_to_ptr.vmem [resolvable:$true] %s1375_s24  ;;  %s1378_s27 = int_to_ptr.hbm [resolvable:$true] %s1377_s27 }
  0x19   :  { %v1713_v5 = vld [vmem:[#allocation8 + $0x1d8] sm:$0xff]  ;;  %211 = vmatpush.msra.mxu2 %v1705_v2  ;;  %v1723_v9 = vld [vmem:[#allocation8 + $0x1e0] sm:$0xff]  ;;  %190 = vmatpush.msra.mxu1 %v1717_v7  ;;  %v1727_v10 = vld [vmem:[#allocation8 + $0xc8] sm:$0xff]  ;;  %s1649_s28 = smov [#allocation14]   ;;  %s1391_s9 = sshll.u32 %s2490_s6, 4  ;;  %s1392_s9 = int_to_ptr.hbm [resolvable:$true] %s1391_s9 }
  0x1a   :  { %231 = vmatpush.msra.mxu3 %v1709_v3  ;;  %v1729_v11 = vld [vmem:[#allocation8 + $0x1c8] sm:$0xff]  ;;  %v1733_v12 = vld [vmem:[#allocation8 + $0xd0] sm:$0xff]  ;;  %171 = vmatpush.msra.mxu0 %v1721_v8  ;;  %v1739_v14 = vld [vmem:[#allocation8 + $0xb8] sm:$0xff]  ;;  %s1389_s29 = sshll.u32 %s1649_s28, 4  ;;  %s1390_s29 = int_to_ptr.vmem [resolvable:$true] %s1389_s29 }
  0x1b   :  { %212 = vmatpush.msra.mxu2 %v1711_v4  ;;  %v1735_v13 = vld [vmem:[#allocation8 + $0x1d0] sm:$0xff]  ;;  %191 = vmatpush.msra.mxu1 %v1723_v9  ;;  %v1741_v15 = vld [vmem:[#allocation8 + $0x1b8] sm:$0xff]  ;;  %v1745_v16 = vld [vmem:[#allocation8 + $0xc0] sm:$0xff] }
  0x1c   :  { %232 = vmatpush.msra.mxu3 %v1713_v5  ;;  %v1747_v17 = vld [vmem:[#allocation8 + $0x1c0] sm:$0xff]  ;;  %172 = vmatpush.msra.mxu0 %v1733_v12  ;;  %v1751_v18 = vld [vmem:[#allocation8 + $0xa8] sm:$0xff]  ;;  %v1757_v20 = vld [vmem:[#allocation8 + $0xb0] sm:$0xff] }
  0x1d   :  { %213 = vmatpush.msra.mxu2 %v1727_v10  ;;  %192 = vmatpush.msra.mxu1 %v1735_v13  ;;  %v1753_v19 = vld [vmem:[#allocation8 + $0x1a8] sm:$0xff]  ;;  %v1759_v21 = vld [vmem:[#allocation8 + $0x1b0] sm:$0xff]  ;;  %v1763_v22 = vld [vmem:[#allocation8 + $0x98] sm:$0xff] }
  0x1e   :  { %233 = vmatpush.msra.mxu3 %v1729_v11  ;;  %173 = vmatpush.msra.mxu0 %v1745_v16  ;;  %v1765_v23 = vld [vmem:[#allocation8 + $0x198] sm:$0xff]  ;;  %v1769_v24 = vld [vmem:[#allocation8 + $0xa0] sm:$0xff]  ;;  %v1775_v26 = vld [vmem:[#allocation8 + $0x88] sm:$0xff] }
  0x1f   :  { %214 = vmatpush.msra.mxu2 %v1739_v14  ;;  %193 = vmatpush.msra.mxu1 %v1747_v17  ;;  %v1771_v25 = vld [vmem:[#allocation8 + $0x1a0] sm:$0xff]  ;;  %v1777_v27 = vld [vmem:[#allocation8 + $0x188] sm:$0xff]  ;;  %v1781_v28 = vld [vmem:[#allocation8 + $0x90] sm:$0xff] }
  0x20   :  { %234 = vmatpush.msra.mxu3 %v1741_v15  ;;  %174 = vmatpush.msra.mxu0 %v1757_v20  ;;  %v1783_v29 = vld [vmem:[#allocation8 + $0x190] sm:$0xff]  ;;  %v1787_v30 = vld [vmem:[#allocation8 + $0x78] sm:$0xff]  ;;  %v1793_v32 = vld [vmem:[#allocation8 + $0x80] sm:$0xff] }
  0x21   :  { %215 = vmatpush.msra.mxu2 %v1751_v18  ;;  %194 = vmatpush.msra.mxu1 %v1759_v21  ;;  %v1789_v31 = vld [vmem:[#allocation8 + $0x178] sm:$0xff]  ;;  %v1795_v33 = vld [vmem:[#allocation8 + $0x180] sm:$0xff]  ;;  %v1799_v34 = vld [vmem:[#allocation8 + $0x68] sm:$0xff] }
  0x22   :  { %235 = vmatpush.msra.mxu3 %v1753_v19  ;;  %175 = vmatpush.msra.mxu0 %v1769_v24  ;;  %v1801_v35 = vld [vmem:[#allocation8 + $0x168] sm:$0xff]  ;;  %v1805_v36 = vld [vmem:[#allocation8 + $0x70] sm:$0xff]  ;;  %v1811_v38 = vld [vmem:[#allocation8 + $0x58] sm:$0xff] }
  0x23   :  { %216 = vmatpush.msra.mxu2 %v1763_v22  ;;  %195 = vmatpush.msra.mxu1 %v1771_v25  ;;  %v1807_v37 = vld [vmem:[#allocation8 + $0x170] sm:$0xff]  ;;  %v1813_v39 = vld [vmem:[#allocation8 + $0x158] sm:$0xff]  ;;  %v1817_v40 = vld [vmem:[#allocation8 + $0x60] sm:$0xff] }
  0x24   :  { %236 = vmatpush.msra.mxu3 %v1765_v23  ;;  %176 = vmatpush.msra.mxu0 %v1781_v28  ;;  %v1819_v41 = vld [vmem:[#allocation8 + $0x160] sm:$0xff]  ;;  %v1823_v42 = vld [vmem:[#allocation8 + $0x48] sm:$0xff]  ;;  %v1829_v44 = vld [vmem:[#allocation8 + $0x50] sm:$0xff] }
  0x25   :  { %217 = vmatpush.msra.mxu2 %v1775_v26  ;;  %196 = vmatpush.msra.mxu1 %v1783_v29  ;;  %v1825_v43 = vld [vmem:[#allocation8 + $0x148] sm:$0xff]  ;;  %v1831_v45 = vld [vmem:[#allocation8 + $0x150] sm:$0xff]  ;;  %v1835_v46 = vld [vmem:[#allocation8 + $0x38] sm:$0xff] }
  0x26   :  { %237 = vmatpush.msra.mxu3 %v1777_v27  ;;  %177 = vmatpush.msra.mxu0 %v1793_v32  ;;  %2530 = vst [vmem:[#allocation20_spill] sm:$0xff] %v1825_v43  ;;  %v1837_v47 = vld [vmem:[#allocation8 + $0x138] sm:$0xff]  ;;  %v1841_v48 = vld [vmem:[#allocation8 + $0x40] sm:$0xff]  ;;  %v1847_v50 = vld [vmem:[#allocation8 + $0x28] sm:$0xff] }
  0x27   :  { %218 = vmatpush.msra.mxu2 %v1787_v30  ;;  %197 = vmatpush.msra.mxu1 %v1795_v33  ;;  %2531 = vst [vmem:[#allocation21_spill] sm:$0xff] %v1837_v47  ;;  %v1843_v49 = vld [vmem:[#allocation8 + $0x140] sm:$0xff]  ;;  %v1849_v51 = vld [vmem:[#allocation8 + $0x128] sm:$0xff]  ;;  %v1853_v52 = vld [vmem:[#allocation8 + $0x30] sm:$0xff] }
  0x28   :  { %238 = vmatpush.msra.mxu3 %v1789_v31  ;;  %178 = vmatpush.msra.mxu0 %v1805_v36  ;;  %2532 = vst [vmem:[#allocation22_spill] sm:$0xff] %v1847_v50  ;;  %v1855_v53 = vld [vmem:[#allocation8 + $0x130] sm:$0xff]  ;;  %v1859_v54 = vld [vmem:[#allocation8 + $0x18] sm:$0xff]  ;;  %v1865_v56 = vld [vmem:[#allocation8 + $0x20] sm:$0xff] }
  0x29   :  { %219 = vmatpush.msra.mxu2 %v1799_v34  ;;  %198 = vmatpush.msra.mxu1 %v1807_v37  ;;  %2533 = vst [vmem:[#allocation23_spill] sm:$0xff] %v1849_v51  ;;  %v1861_v55 = vld [vmem:[#allocation8 + $0x118] sm:$0xff]  ;;  %v1867_v57 = vld [vmem:[#allocation8 + $0x120] sm:$0xff]  ;;  %v1871_v58 = vld [vmem:[#allocation8 + $0x8] sm:$0xff] }
  0x2a   :  { %239 = vmatpush.msra.mxu3 %v1801_v35  ;;  %179 = vmatpush.msra.mxu0 %v1817_v40  ;;  %2534 = vst [vmem:[#allocation24_spill] sm:$0xff] %v1855_v53  ;;  %v1873_v59 = vld [vmem:[#allocation8 + $0x108] sm:$0xff]  ;;  %v97_v60 = vld [vmem:[#allocation9] sm:$0xff]  ;;  %v1879_v62 = vld [vmem:[#allocation8 + $0x10] sm:$0xff] }
  0x2b   :  { %220 = vmatpush.msra.mxu2 %v1811_v38  ;;  %199 = vmatpush.msra.mxu1 %v1819_v41  ;;  %2535 = vst [vmem:[#allocation25_spill] sm:$0xff] %v1859_v54  ;;  %v98_v61 = vld [vmem:[#allocation9 + $0x8] sm:$0xff]  ;;  %v1881_v63 = vld [vmem:[#allocation8 + $0x110] sm:$0xff] }
  0x2c   :  { %240 = vmatpush.msra.mxu3 %v1813_v39  ;;  %180 = vmatpush.msra.mxu0 %v1829_v44  ;;  %2536 = vst [vmem:[#allocation26_spill] sm:$0xff] %v1861_v55 }
  0x2d   :  { %221 = vmatpush.msra.mxu2 %v1823_v42  ;;  %200 = vmatpush.msra.mxu1 %v1831_v45  ;;  %2537 = vst [vmem:[#allocation27_spill] sm:$0xff] %v1865_v56 }
  0x2e   :  { %241 = vmatpush.msra.mxu3 %v1825_v43  ;;  %181 = vmatpush.msra.mxu0 %v1841_v48  ;;  %2538 = vst [vmem:[#allocation28_spill] sm:$0xff] %v1867_v57 }
  0x2f   :  { %222 = vmatpush.msra.mxu2 %v1835_v46  ;;  %201 = vmatpush.msra.mxu1 %v1843_v49  ;;  %2539 = vst [vmem:[#allocation29_spill] sm:$0xff] %v1871_v58 }
  0x30   :  { %242 = vmatpush.msra.mxu3 %v1837_v47  ;;  %182 = vmatpush.msra.mxu0 %v1853_v52  ;;  %2540 = vst [vmem:[#allocation30_spill] sm:$0xff] %v1879_v62 }
  0x31   :  { %223 = vmatpush.msra.mxu2 %v1847_v50  ;;  %202 = vmatpush.msra.mxu1 %v1855_v53  ;;  %2541 = vst [vmem:[#allocation31_spill] sm:$0xff] %v1881_v63 }
  0x32   :  { %243 = vmatpush.msra.mxu3 %v1849_v51  ;;  %183 = vmatpush.msra.mxu0 %v1865_v56  ;;  %v1885_v51 = vld [vmem:[#allocation8] sm:$0xff] }
  0x33   :  { %224 = vmatpush.msra.mxu2 %v1859_v54  ;;  %203 = vmatpush.msra.mxu1 %v1867_v57  ;;  %v1887_v54 = vld [vmem:[#allocation8 + $0x100] sm:$0xff] }
  0x34   :  { %244 = vmatpush.msra.mxu3 %v1861_v55  ;;  %184 = vmatpush.msra.mxu0 %v1879_v62 }
  0x35   :  { %225 = vmatpush.msra.mxu2 %v1871_v58  ;;  %204 = vmatpush.msra.mxu1 %v1881_v63 }
  0x36   :  { %245 = vmatpush.msra.mxu3 %v1873_v59  ;;  %226 = vmatmul.f32.vlgmr.msra.gmra.mxu2 %v97_v60 }
  0x37   :  { %246 = vmatmul.f32.vlgmr.msra.gmra.mxu3 %v98_v61  ;;  %365 = vmatpush.msrb.mxu2 %v1701_v0 }
  0x38   :  { %385 = vmatpush.msrb.mxu3 %v1703_v1  ;;  %185 = vmatpush.msra.mxu0 %v1885_v51 }
  0x39   :  { %205 = vmatpush.msra.mxu1 %v1887_v54  ;;  %186 = vmatmul.f32.vlgmr.msra.gmra.mxu0 %v97_v60  ;;  %v2542_v60 = vld [vmem:[#allocation23_spill] sm:$0xff] }
  0x3a   :  { %206 = vmatmul.f32.vlgmr.msra.gmra.mxu1 %v98_v61  ;;  %325 = vmatpush.msrb.mxu0 %v1715_v6  ;;  %v2543_v61 = vld [vmem:[#allocation25_spill] sm:$0xff] }
  0x3b   :  { %345 = vmatpush.msrb.mxu1 %v1717_v7  ;;  %366 = vmatpush.msrb.mxu2 %v1705_v2 }
  0x3c   :  { %386 = vmatpush.msrb.mxu3 %v1709_v3  ;;  %326 = vmatpush.msrb.mxu0 %v1721_v8 }
  0x3d   :  { %346 = vmatpush.msrb.mxu1 %v1723_v9  ;;  %367 = vmatpush.msrb.mxu2 %v1711_v4 }
  0x3e   :  { %387 = vmatpush.msrb.mxu3 %v1713_v5  ;;  %327 = vmatpush.msrb.mxu0 %v1733_v12 }
  0x3f   :  { %347 = vmatpush.msrb.mxu1 %v1735_v13  ;;  %368 = vmatpush.msrb.mxu2 %v1727_v10 }
  0x40   :  { %388 = vmatpush.msrb.mxu3 %v1729_v11  ;;  %328 = vmatpush.msrb.mxu0 %v1745_v16 }
  0x41   :  { %348 = vmatpush.msrb.mxu1 %v1747_v17  ;;  %369 = vmatpush.msrb.mxu2 %v1739_v14 }
  0x42   :  { %389 = vmatpush.msrb.mxu3 %v1741_v15  ;;  %329 = vmatpush.msrb.mxu0 %v1757_v20 }
  0x43   :  { %349 = vmatpush.msrb.mxu1 %v1759_v21  ;;  %370 = vmatpush.msrb.mxu2 %v1751_v18 }
  0x44   :  { %390 = vmatpush.msrb.mxu3 %v1753_v19  ;;  %330 = vmatpush.msrb.mxu0 %v1769_v24 }
  0x45   :  { %350 = vmatpush.msrb.mxu1 %v1771_v25  ;;  %371 = vmatpush.msrb.mxu2 %v1763_v22 }
  0x46   :  { %391 = vmatpush.msrb.mxu3 %v1765_v23  ;;  %331 = vmatpush.msrb.mxu0 %v1781_v28 }
  0x47   :  { %351 = vmatpush.msrb.mxu1 %v1783_v29  ;;  %372 = vmatpush.msrb.mxu2 %v1775_v26 }
  0x48   :  { %392 = vmatpush.msrb.mxu3 %v1777_v27  ;;  %332 = vmatpush.msrb.mxu0 %v1793_v32 }
  0x49   :  { %352 = vmatpush.msrb.mxu1 %v1795_v33  ;;  %373 = vmatpush.msrb.mxu2 %v1787_v30 }
  0x4a   :  { %393 = vmatpush.msrb.mxu3 %v1789_v31  ;;  %333 = vmatpush.msrb.mxu0 %v1805_v36 }
  0x4b   :  { %353 = vmatpush.msrb.mxu1 %v1807_v37  ;;  %374 = vmatpush.msrb.mxu2 %v1799_v34 }
  0x4c   :  { %394 = vmatpush.msrb.mxu3 %v1801_v35  ;;  %334 = vmatpush.msrb.mxu0 %v1817_v40 }
  0x4d   :  { %354 = vmatpush.msrb.mxu1 %v1819_v41  ;;  %375 = vmatpush.msrb.mxu2 %v1811_v38 }
  0x4e   :  { %395 = vmatpush.msrb.mxu3 %v1813_v39  ;;  %335 = vmatpush.msrb.mxu0 %v1829_v44 }
  0x4f   :  { %355 = vmatpush.msrb.mxu1 %v1831_v45  ;;  %376 = vmatpush.msrb.mxu2 %v1823_v42 }
  0x50   :  { %396 = vmatpush.msrb.mxu3 %v1825_v43  ;;  %336 = vmatpush.msrb.mxu0 %v1841_v48 }
  0x51   :  { %356 = vmatpush.msrb.mxu1 %v1843_v49  ;;  %377 = vmatpush.msrb.mxu2 %v1835_v46 }
  0x52   :  { %397 = vmatpush.msrb.mxu3 %v1837_v47  ;;  %337 = vmatpush.msrb.mxu0 %v1853_v52 }
  0x53   :  { %357 = vmatpush.msrb.mxu1 %v1855_v53  ;;  %378 = vmatpush.msrb.mxu2 %v1847_v50 }
  0x54   :  { %398 = vmatpush.msrb.mxu3 %v2542_v60  ;;  %338 = vmatpush.msrb.mxu0 %v1865_v56 }
  0x55   :  { %358 = vmatpush.msrb.mxu1 %v1867_v57  ;;  %379 = vmatpush.msrb.mxu2 %v2543_v61 }
  0x56   :  { %399 = vmatpush.msrb.mxu3 %v1861_v55  ;;  %339 = vmatpush.msrb.mxu0 %v1879_v62 }
  0x57   :  { %359 = vmatpush.msrb.mxu1 %v1881_v63  ;;  %380 = vmatpush.msrb.mxu2 %v1871_v58 }
  0x58   :  { %400 = vmatpush.msrb.mxu3 %v1873_v59  ;;  %340 = vmatpush.msrb.mxu0 %v1885_v51 }
  0x59   :  { %360 = vmatpush.msrb.mxu1 %v1887_v54  ;;  %521 = vmatpush.msra.mxu2 %v1701_v0 }
  0x5a   :  { %481 = vmatpush.msra.mxu0 %v1715_v6  ;;  %541 = vmatpush.msra.mxu3 %v1703_v1 }
  0x5b   :  { %501 = vmatpush.msra.mxu1 %v1717_v7  ;;  %522 = vmatpush.msra.mxu2 %v1705_v2 }
  0x5c   :  { %482 = vmatpush.msra.mxu0 %v1721_v8  ;;  %542 = vmatpush.msra.mxu3 %v1709_v3 }
  0x5d   :  { %502 = vmatpush.msra.mxu1 %v1723_v9  ;;  %523 = vmatpush.msra.mxu2 %v1711_v4 }
  0x5e   :  { %483 = vmatpush.msra.mxu0 %v1733_v12  ;;  %543 = vmatpush.msra.mxu3 %v1713_v5 }
  0x5f   :  { %503 = vmatpush.msra.mxu1 %v1735_v13  ;;  %524 = vmatpush.msra.mxu2 %v1727_v10 }
  0x60   :  { %484 = vmatpush.msra.mxu0 %v1745_v16  ;;  %544 = vmatpush.msra.mxu3 %v1729_v11 }
  0x61   :  { %504 = vmatpush.msra.mxu1 %v1747_v17  ;;  %525 = vmatpush.msra.mxu2 %v1739_v14 }
  0x62   :  { %485 = vmatpush.msra.mxu0 %v1757_v20  ;;  %545 = vmatpush.msra.mxu3 %v1741_v15 }
  0x63   :  { %505 = vmatpush.msra.mxu1 %v1759_v21  ;;  %526 = vmatpush.msra.mxu2 %v1751_v18 }
  0x64   :  { %486 = vmatpush.msra.mxu0 %v1769_v24  ;;  %546 = vmatpush.msra.mxu3 %v1753_v19 }
  0x65   :  { %506 = vmatpush.msra.mxu1 %v1771_v25  ;;  %527 = vmatpush.msra.mxu2 %v1763_v22 }
  0x66   :  { %487 = vmatpush.msra.mxu0 %v1781_v28  ;;  %547 = vmatpush.msra.mxu3 %v1765_v23 }
  0x67   :  { %507 = vmatpush.msra.mxu1 %v1783_v29  ;;  %528 = vmatpush.msra.mxu2 %v1775_v26 }
  0x68   :  { %488 = vmatpush.msra.mxu0 %v1793_v32  ;;  %548 = vmatpush.msra.mxu3 %v1777_v27 }
  0x69   :  { %508 = vmatpush.msra.mxu1 %v1795_v33  ;;  %529 = vmatpush.msra.mxu2 %v1787_v30 }
  0x6a   :  { %489 = vmatpush.msra.mxu0 %v1805_v36  ;;  %549 = vmatpush.msra.mxu3 %v1789_v31 }
  0x6b   :  { %509 = vmatpush.msra.mxu1 %v1807_v37  ;;  %530 = vmatpush.msra.mxu2 %v1799_v34 }
  0x6c   :  { %490 = vmatpush.msra.mxu0 %v1817_v40  ;;  %550 = vmatpush.msra.mxu3 %v1801_v35 }
  0x6d   :  { %510 = vmatpush.msra.mxu1 %v1819_v41  ;;  %531 = vmatpush.msra.mxu2 %v1811_v38 }
  0x6e   :  { %491 = vmatpush.msra.mxu0 %v1829_v44  ;;  %551 = vmatpush.msra.mxu3 %v1813_v39 }
  0x6f   :  { %511 = vmatpush.msra.mxu1 %v1831_v45  ;;  %532 = vmatpush.msra.mxu2 %v1823_v42 }
  0x70   :  { %492 = vmatpush.msra.mxu0 %v1841_v48  ;;  %552 = vmatpush.msra.mxu3 %v1825_v43 }
  0x71   :  { %512 = vmatpush.msra.mxu1 %v1843_v49  ;;  %533 = vmatpush.msra.mxu2 %v1835_v46 }
  0x72   :  { %493 = vmatpush.msra.mxu0 %v1853_v52  ;;  %553 = vmatpush.msra.mxu3 %v1837_v47 }
  0x73   :  { %513 = vmatpush.msra.mxu1 %v1855_v53  ;;  %534 = vmatpush.msra.mxu2 %v1847_v50 }
  0x74   :  { %494 = vmatpush.msra.mxu0 %v1865_v56  ;;  %554 = vmatpush.msra.mxu3 %v2542_v60 }
  0x75   :  { %514 = vmatpush.msra.mxu1 %v1867_v57  ;;  %535 = vmatpush.msra.mxu2 %v2543_v61  ;;  %v103_v57 = vld [vmem:[#allocation3] sm:$0xff] }
  0x76   :  { %495 = vmatpush.msra.mxu0 %v1879_v62  ;;  %555 = vmatpush.msra.mxu3 %v1861_v55  ;;  %v105_v62 = vld [vmem:[#allocation6 + $0x38] sm:$0xff] }
  0x77   :  { %515 = vmatpush.msra.mxu1 %v1881_v63  ;;  %536 = vmatpush.msra.mxu2 %v1871_v58 }
  0x78   :  { %496 = vmatpush.msra.mxu0 %v1885_v51  ;;  %556 = vmatpush.msra.mxu3 %v1873_v59 }
  0x79   :  { %516 = vmatpush.msra.mxu1 %v1887_v54 }
  0xb6   :  { %v187_v47 = vpop.f32.mrf.mxu0 }
  0xb7   :  { %v207_v53 = vpop.f32.mrf.mxu1 }
  0xb8   :  { %v208_v60 = vadd.f32 %v207_v53, %v187_v47  ;;  %v414_v47 = vld [vmem:[#allocation3 + $0x10] sm:$0xff] }
  0xb9   :  { %v227_v50 = vpop.f32.mrf.mxu2 }
  0xba   :  { %v247_v56 = vpop.f32.mrf.mxu3  ;;  %v250_v61 = vadd.f32 %v208_v60, %v103_v57  ;;  %v2161_v60 = vld [vmem:[#allocation8 + $0x70] sm:$0xff] }
  0xbb   :  { %v248_v43 = vadd.f32 %v247_v56, %v227_v50 }
  0xbc   :  { %1429 = vtanh.f32 %v250_v61  ;;  %v2163_v61 = vld [vmem:[#allocation8 + $0x1a0] sm:$0xff] }
  0xbd   :  { %v251_v63 = vadd.f32 %v248_v43, %v105_v62  ;;  %v2136_v43 = vld [vmem:[#allocation8 + $0xa8] sm:$0xff] }
  0xbe   :  { %v2155_v62 = vld [vmem:[#allocation8 + $0x88] sm:$0xff] }
  0xbf   :  { %1431 = vtanh.f32 %v251_v63  ;;  %v2159_v63 = vld [vmem:[#allocation8 + $0x1b8] sm:$0xff] }
  0xc2   :  { %v1430_v55 = vpop.eup %1429 }
  0xc3   :  { %254 = vst [vmem:[#allocation11] sm:$0xff] %v1430_v55  ;;  %341 = vmatmul.f32.vlgmr.msrb.gmra.mxu0 %v1430_v55  ;;  %381 = vmatmul.f32.vlgmr.msrb.gmra.mxu2 %v1430_v55 }
  0xc4   :  { %637 = vmatpush.msrb.mxu0 %v1715_v6  ;;  %677 = vmatpush.msrb.mxu2 %v1701_v0  ;;  %v2544_v0 = vld [vmem:[#allocation20_spill] sm:$0xff]  ;;  %v2550_v6 = vld [vmem:[#allocation25_spill] sm:$0xff] }
  0xc5   :  { %v1432_v58 = vpop.eup %1431 }
  0xc6   :  { %256 = vst [vmem:[#allocation12 + $0x38] sm:$0xff] %v1432_v58  ;;  %361 = vmatmul.f32.vlgmr.msrb.gmra.mxu1 %v1432_v58  ;;  %401 = vmatmul.f32.vlgmr.msrb.gmra.mxu3 %v1432_v58  ;;  %v2151_v58 = vld [vmem:[#allocation8 + $0x80] sm:$0xff] }
  0xc7   :  { %638 = vmatpush.msrb.mxu0 %v1721_v8  ;;  %678 = vmatpush.msrb.mxu2 %v1705_v2  ;;  %v2546_v2 = vld [vmem:[#allocation22_spill] sm:$0xff]  ;;  %v2552_v8 = vld [vmem:[#allocation23_spill] sm:$0xff] }
  0xc8   :  { %657 = vmatpush.msrb.mxu1 %v1717_v7  ;;  %697 = vmatpush.msrb.mxu3 %v1703_v1  ;;  %v2545_v1 = vld [vmem:[#allocation27_spill] sm:$0xff]  ;;  %v2551_v7 = vld [vmem:[#allocation28_spill] sm:$0xff]  ;;  %2558 = vst [vmem:[#allocation22_spill] sm:$0xff] %v2151_v58 }
  0xc9   :  { %639 = vmatpush.msrb.mxu0 %v1733_v12  ;;  %679 = vmatpush.msrb.mxu2 %v1711_v4  ;;  %v2548_v4 = vld [vmem:[#allocation21_spill] sm:$0xff] }
  0xca   :  { %658 = vmatpush.msrb.mxu1 %v1723_v9  ;;  %698 = vmatpush.msrb.mxu3 %v1709_v3  ;;  %v2547_v3 = vld [vmem:[#allocation24_spill] sm:$0xff]  ;;  %v2553_v9 = vld [vmem:[#allocation29_spill] sm:$0xff] }
  0xcb   :  { %640 = vmatpush.msrb.mxu0 %v1745_v16  ;;  %680 = vmatpush.msrb.mxu2 %v1727_v10  ;;  %v2554_v10 = vld [vmem:[#allocation31_spill] sm:$0xff]  ;;  %2559 = vst [vmem:[#allocation24_spill] sm:$0xff] %v2155_v62 }
  0xcc   :  { %659 = vmatpush.msrb.mxu1 %v1735_v13  ;;  %699 = vmatpush.msrb.mxu3 %v1713_v5  ;;  %v2549_v5 = vld [vmem:[#allocation30_spill] sm:$0xff]  ;;  %v258_v13 = vld [vmem:[#allocation3 + $0x8] sm:$0xff] }
  0xcd   :  { %641 = vmatpush.msrb.mxu0 %v1757_v20  ;;  %681 = vmatpush.msrb.mxu2 %v1739_v14 }
  0xce   :  { %660 = vmatpush.msrb.mxu1 %v1747_v17  ;;  %700 = vmatpush.msrb.mxu3 %v1729_v11  ;;  %v2555_v11 = vld [vmem:[#allocation26_spill] sm:$0xff] }
  0xcf   :  { %642 = vmatpush.msrb.mxu0 %v1769_v24  ;;  %682 = vmatpush.msrb.mxu2 %v1751_v18  ;;  %v260_v18 = vld [vmem:[#allocation6 + $0x30] sm:$0xff] }
  0xd0   :  { %661 = vmatpush.msrb.mxu1 %v1759_v21  ;;  %701 = vmatpush.msrb.mxu3 %v1741_v15  ;;  %v2085_v24 = vld [vmem:[#allocation8 + $0xf0] sm:$0xff] }
  0xd1   :  { %643 = vmatpush.msrb.mxu0 %v1781_v28  ;;  %683 = vmatpush.msrb.mxu2 %v1763_v22  ;;  %v2095_v28 = vld [vmem:[#allocation8 + $0xd0] sm:$0xff] }
  0xd2   :  { %662 = vmatpush.msrb.mxu1 %v1771_v25  ;;  %702 = vmatpush.msrb.mxu3 %v1753_v19  ;;  %v2087_v25 = vld [vmem:[#allocation8 + $0xf8] sm:$0xff] }
  0xd3   :  { %644 = vmatpush.msrb.mxu0 %v1793_v32  ;;  %684 = vmatpush.msrb.mxu2 %v1775_v26  ;;  %v2089_v26 = vld [vmem:[#allocation8 + $0xe0] sm:$0xff] }
  0xd4   :  { %663 = vmatpush.msrb.mxu1 %v1783_v29  ;;  %703 = vmatpush.msrb.mxu3 %v1765_v23  ;;  %v2097_v29 = vld [vmem:[#allocation8 + $0xd8] sm:$0xff]  ;;  %v2105_v32 = vld [vmem:[#allocation8 + $0x1e0] sm:$0xff] }
  0xd5   :  { %645 = vmatpush.msrb.mxu0 %v1805_v36  ;;  %685 = vmatpush.msrb.mxu2 %v1787_v30  ;;  %v2099_v30 = vld [vmem:[#allocation8 + $0x1f0] sm:$0xff] }
  0xd6   :  { %664 = vmatpush.msrb.mxu1 %v1795_v33  ;;  %704 = vmatpush.msrb.mxu3 %v1777_v27  ;;  %v2093_v27 = vld [vmem:[#allocation8 + $0xe8] sm:$0xff]  ;;  %v2107_v33 = vld [vmem:[#allocation8 + $0xc0] sm:$0xff]  ;;  %v2117_v36 = vld [vmem:[#allocation8 + $0x1d0] sm:$0xff] }
  0xd7   :  { %646 = vmatpush.msrb.mxu0 %v1817_v40  ;;  %686 = vmatpush.msrb.mxu2 %v1799_v34  ;;  %v2110_v34 = vld [vmem:[#allocation8 + $0xc8] sm:$0xff]  ;;  %v2129_v40 = vld [vmem:[#allocation8 + $0x1c0] sm:$0xff] }
  0xd8   :  { %665 = vmatpush.msrb.mxu1 %v1807_v37  ;;  %705 = vmatpush.msrb.mxu3 %v1789_v31  ;;  %v2103_v31 = vld [vmem:[#allocation8 + $0x1f8] sm:$0xff] }
  0xd9   :  { %647 = vmatpush.msrb.mxu0 %v1829_v44  ;;  %687 = vmatpush.msrb.mxu2 %v1811_v38  ;;  %v2119_v37 = vld [vmem:[#allocation8 + $0x1d8] sm:$0xff]  ;;  %v2121_v38 = vld [vmem:[#allocation8 + $0xb0] sm:$0xff] }
  0xda   :  { %666 = vmatpush.msrb.mxu1 %v1819_v41  ;;  %706 = vmatpush.msrb.mxu3 %v1801_v35  ;;  %v2113_v35 = vld [vmem:[#allocation8 + $0x1e8] sm:$0xff]  ;;  %v2141_v44 = vld [vmem:[#allocation8 + $0x90] sm:$0xff] }
  0xdb   :  { %648 = vmatpush.msrb.mxu0 %v1841_v48  ;;  %688 = vmatpush.msrb.mxu2 %v1823_v42  ;;  %v2131_v41 = vld [vmem:[#allocation8 + $0x1c8] sm:$0xff]  ;;  %v2133_v42 = vld [vmem:[#allocation8 + $0xa0] sm:$0xff]  ;;  %2556 = vst [vmem:[#allocation20_spill] sm:$0xff] %v2141_v44 }
  0xdc   :  { %667 = vmatpush.msrb.mxu1 %v1831_v45  ;;  %707 = vmatpush.msrb.mxu3 %v1813_v39  ;;  %v2124_v39 = vld [vmem:[#allocation8 + $0xb8] sm:$0xff] }
  0xdd   :  { %649 = vmatpush.msrb.mxu0 %v1853_v52  ;;  %689 = vmatpush.msrb.mxu2 %v1835_v46  ;;  %v2144_v45 = vld [vmem:[#allocation8 + $0x98] sm:$0xff]  ;;  %v416_v52 = vld [vmem:[#allocation6 + $0x28] sm:$0xff] }
  0xde   :  { %668 = vmatpush.msrb.mxu1 %v1843_v49  ;;  %708 = vmatpush.msrb.mxu3 %v2544_v0  ;;  %2557 = vst [vmem:[#allocation27_spill] sm:$0xff] %v2144_v45  ;;  %v2167_v0 = vld [vmem:[#allocation8 + $0x78] sm:$0xff] }
  0xdf   :  { %650 = vmatpush.msrb.mxu0 %v2545_v1  ;;  %690 = vmatpush.msrb.mxu2 %v2546_v2  ;;  %2560 = vst [vmem:[#allocation21_spill] sm:$0xff] %v2167_v0  ;;  %v2169_v1 = vld [vmem:[#allocation8 + $0x1a8] sm:$0xff]  ;;  %v2171_v2 = vld [vmem:[#allocation8 + $0x60] sm:$0xff] }
  0xe0   :  { %669 = vmatpush.msrb.mxu1 %v2547_v3  ;;  %709 = vmatpush.msrb.mxu3 %v2548_v4  ;;  %v2175_v3 = vld [vmem:[#allocation8 + $0x190] sm:$0xff]  ;;  %v2177_v4 = vld [vmem:[#allocation8 + $0x68] sm:$0xff] }
  0xe1   :  { %651 = vmatpush.msrb.mxu0 %v2549_v5  ;;  %691 = vmatpush.msrb.mxu2 %v2550_v6  ;;  %v2179_v5 = vld [vmem:[#allocation8 + $0x198] sm:$0xff]  ;;  %v2187_v6 = vld [vmem:[#allocation8 + $0x50] sm:$0xff] }
  0xe2   :  { %670 = vmatpush.msrb.mxu1 %v2551_v7  ;;  %710 = vmatpush.msrb.mxu3 %v2552_v8  ;;  %2561 = vst [vmem:[#allocation30_spill] sm:$0xff] %v2187_v6  ;;  %v2189_v7 = vld [vmem:[#allocation8 + $0x180] sm:$0xff]  ;;  %v2191_v8 = vld [vmem:[#allocation8 + $0x58] sm:$0xff] }
  0xe3   :  { %652 = vmatpush.msrb.mxu0 %v1885_v51  ;;  %692 = vmatpush.msrb.mxu2 %v2553_v9  ;;  %v2195_v9 = vld [vmem:[#allocation8 + $0x188] sm:$0xff] }
  0xe4   :  { %671 = vmatpush.msrb.mxu1 %v2554_v10  ;;  %711 = vmatpush.msrb.mxu3 %v2555_v11  ;;  %v2199_v10 = vld [vmem:[#allocation8 + $0x40] sm:$0xff]  ;;  %v2201_v11 = vld [vmem:[#allocation8 + $0x170] sm:$0xff] }
  0xe6   :  { %672 = vmatpush.msrb.mxu1 %v1887_v54  ;;  %712 = vmatpush.msrb.mxu3 %v1873_v59  ;;  %v2153_v59 = vld [vmem:[#allocation8 + $0x1b0] sm:$0xff] }
 0x140   :  { %v342_v12 = vpop.f32.mrf.mxu0 }
 0x143   :  { %v362_v14 = vpop.f32.mrf.mxu1 }
 0x144   :  { %v363_v15 = vadd.f32 %v362_v14, %v342_v12  ;;  %v2203_v12 = vld [vmem:[#allocation8 + $0x48] sm:$0xff]  ;;  %v2211_v14 = vld [vmem:[#allocation8 + $0x30] sm:$0xff] }
 0x146   :  { %v405_v16 = vadd.f32 %v363_v15, %v258_v13  ;;  %v382_v17 = vpop.f32.mrf.mxu2  ;;  %v2207_v13 = vld [vmem:[#allocation8 + $0x178] sm:$0xff]  ;;  %v2213_v15 = vld [vmem:[#allocation8 + $0x160] sm:$0xff] }
 0x148   :  { %1433 = vtanh.f32 %v405_v16  ;;  %v2215_v16 = vld [vmem:[#allocation8 + $0x38] sm:$0xff] }
 0x149   :  { %v402_v19 = vpop.f32.mrf.mxu3 }
 0x14a   :  { %v403_v20 = vadd.f32 %v402_v19, %v382_v17  ;;  %v2219_v17 = vld [vmem:[#allocation8 + $0x168] sm:$0xff]  ;;  %v2225_v19 = vld [vmem:[#allocation8 + $0x150] sm:$0xff] }
 0x14c   :  { %v406_v21 = vadd.f32 %v403_v20, %v260_v18  ;;  %v2223_v18 = vld [vmem:[#allocation8 + $0x20] sm:$0xff]  ;;  %v2227_v20 = vld [vmem:[#allocation8 + $0x28] sm:$0xff] }
 0x14e   :  { %v1434_v22 = vpop.eup %1433  ;;  %1435 = vtanh.f32 %v406_v21  ;;  %v2231_v21 = vld [vmem:[#allocation8 + $0x158] sm:$0xff] }
 0x14f   :  { %410 = vst [vmem:[#allocation11 + $0x8] sm:$0xff] %v1434_v22  ;;  %497 = vmatmul.f32.vlgmr.msra.gmra.mxu0 %v1434_v22  ;;  %537 = vmatmul.f32.vlgmr.msra.gmra.mxu2 %v1434_v22  ;;  %v2235_v22 = vld [vmem:[#allocation8 + $0x10] sm:$0xff] }
 0x150   :  { %793 = vmatpush.msra.mxu0 %v2085_v24  ;;  %833 = vmatpush.msra.mxu2 %v2087_v25  ;;  %2562 = vst [vmem:[#allocation25_spill] sm:$0xff] %v2231_v21 }
 0x151   :  { %2563 = vst [vmem:[#allocation28_spill] sm:$0xff] %v2235_v22 }
 0x152   :  { %794 = vmatpush.msra.mxu0 %v2089_v26  ;;  %834 = vmatpush.msra.mxu2 %v2093_v27 }
 0x154   :  { %v1436_v23 = vpop.eup %1435  ;;  %795 = vmatpush.msra.mxu0 %v2095_v28  ;;  %835 = vmatpush.msra.mxu2 %v2097_v29 }
 0x155   :  { %412 = vst [vmem:[#allocation12 + $0x30] sm:$0xff] %v1436_v23  ;;  %517 = vmatmul.f32.vlgmr.msra.gmra.mxu1 %v1436_v23  ;;  %557 = vmatmul.f32.vlgmr.msra.gmra.mxu3 %v1436_v23  ;;  %v2237_v23 = vld [vmem:[#allocation8 + $0x140] sm:$0xff] }
 0x156   :  { %813 = vmatpush.msra.mxu1 %v2099_v30  ;;  %853 = vmatpush.msra.mxu3 %v2103_v31  ;;  %2564 = vst [vmem:[#allocation23_spill] sm:$0xff] %v2237_v23 }
 0x157   :  { %796 = vmatpush.msra.mxu0 %v2107_v33  ;;  %836 = vmatpush.msra.mxu2 %v2110_v34 }
 0x158   :  { %814 = vmatpush.msra.mxu1 %v2105_v32  ;;  %854 = vmatpush.msra.mxu3 %v2113_v35 }
 0x159   :  { %797 = vmatpush.msra.mxu0 %v2121_v38  ;;  %837 = vmatpush.msra.mxu2 %v2124_v39 }
 0x15a   :  { %815 = vmatpush.msra.mxu1 %v2117_v36  ;;  %855 = vmatpush.msra.mxu3 %v2119_v37 }
 0x15b   :  { %798 = vmatpush.msra.mxu0 %v2133_v42  ;;  %838 = vmatpush.msra.mxu2 %v2136_v43 }
 0x15c   :  { %816 = vmatpush.msra.mxu1 %v2129_v40  ;;  %856 = vmatpush.msra.mxu3 %v2131_v41 }
 0x15d   :  { %799 = vmatpush.msra.mxu0 %v2141_v44  ;;  %839 = vmatpush.msra.mxu2 %v2144_v45 }
 0x15e   :  { %817 = vmatpush.msra.mxu1 %v2153_v59  ;;  %857 = vmatpush.msra.mxu3 %v2159_v63 }
 0x15f   :  { %800 = vmatpush.msra.mxu0 %v2151_v58  ;;  %840 = vmatpush.msra.mxu2 %v2155_v62 }
 0x160   :  { %818 = vmatpush.msra.mxu1 %v2163_v61  ;;  %858 = vmatpush.msra.mxu3 %v2169_v1 }
 0x161   :  { %801 = vmatpush.msra.mxu0 %v2161_v60  ;;  %841 = vmatpush.msra.mxu2 %v2167_v0 }
 0x162   :  { %819 = vmatpush.msra.mxu1 %v2175_v3  ;;  %859 = vmatpush.msra.mxu3 %v2179_v5 }
 0x163   :  { %802 = vmatpush.msra.mxu0 %v2171_v2  ;;  %842 = vmatpush.msra.mxu2 %v2177_v4 }
 0x164   :  { %820 = vmatpush.msra.mxu1 %v2189_v7  ;;  %860 = vmatpush.msra.mxu3 %v2195_v9 }
 0x165   :  { %803 = vmatpush.msra.mxu0 %v2187_v6  ;;  %843 = vmatpush.msra.mxu2 %v2191_v8 }
 0x166   :  { %821 = vmatpush.msra.mxu1 %v2201_v11  ;;  %861 = vmatpush.msra.mxu3 %v2207_v13 }
 0x167   :  { %804 = vmatpush.msra.mxu0 %v2199_v10  ;;  %844 = vmatpush.msra.mxu2 %v2203_v12 }
 0x168   :  { %822 = vmatpush.msra.mxu1 %v2213_v15  ;;  %862 = vmatpush.msra.mxu3 %v2219_v17 }
 0x169   :  { %805 = vmatpush.msra.mxu0 %v2211_v14  ;;  %845 = vmatpush.msra.mxu2 %v2215_v16 }
 0x16a   :  { %823 = vmatpush.msra.mxu1 %v2225_v19  ;;  %863 = vmatpush.msra.mxu3 %v2231_v21 }
 0x16b   :  { %806 = vmatpush.msra.mxu0 %v2223_v18  ;;  %846 = vmatpush.msra.mxu2 %v2227_v20 }
 0x16c   :  { %824 = vmatpush.msra.mxu1 %v2237_v23 }
 0x16d   :  { %807 = vmatpush.msra.mxu0 %v2235_v22 }
 0x1cc   :  { %v498_v46 = vpop.f32.mrf.mxu0 }
 0x1d2   :  { %v518_v48 = vpop.f32.mrf.mxu1  ;;  %v538_v51 = vpop.f32.mrf.mxu2 }
 0x1d3   :  { %v519_v49 = vadd.f32 %v518_v48, %v498_v46  ;;  %v2241_v46 = vld [vmem:[#allocation8 + $0x18] sm:$0xff]  ;;  %v2247_v48 = vld [vmem:[#allocation8] sm:$0xff] }
 0x1d4   :  { %2565 = vst [vmem:[#allocation29_spill] sm:$0xff] %v2241_v46  ;;  %847 = vmatpush.msra.mxu2 %v2241_v46  ;;  %808 = vmatpush.msra.mxu0 %v2247_v48 }
 0x1d5   :  { %v561_v50 = vadd.f32 %v519_v49, %v414_v47  ;;  %v2243_v47 = vld [vmem:[#allocation8 + $0x148] sm:$0xff]  ;;  %2567 = vst [vmem:[#allocation26_spill] sm:$0xff] %v2247_v48  ;;  %v2249_v49 = vld [vmem:[#allocation8 + $0x130] sm:$0xff] }
 0x1d6   :  { %2566 = vst [vmem:[#allocation31_spill] sm:$0xff] %v2243_v47  ;;  %864 = vmatpush.msra.mxu3 %v2243_v47  ;;  %825 = vmatpush.msra.mxu1 %v2249_v49 }
 0x1d7   :  { %1437 = vtanh.f32 %v561_v50  ;;  %2568 = vst [vmem:[#allocation32_spill] sm:$0xff] %v2249_v49  ;;  %v2251_v50 = vld [vmem:[#allocation8 + $0x8] sm:$0xff] }
 0x1d8   :  { %v558_v53 = vpop.f32.mrf.mxu3  ;;  %2569 = vst [vmem:[#allocation33_spill] sm:$0xff] %v2251_v50  ;;  %848 = vmatpush.msra.mxu2 %v2251_v50 }
 0x1d9   :  { %v559_v54 = vadd.f32 %v558_v53, %v538_v51  ;;  %v2255_v51 = vld [vmem:[#allocation8 + $0x138] sm:$0xff]  ;;  %v2261_v53 = vld [vmem:[#allocation8 + $0x128] sm:$0xff] }
 0x1da   :  { %2570 = vst [vmem:[#allocation34_spill] sm:$0xff] %v2255_v51  ;;  %865 = vmatpush.msra.mxu3 %v2255_v51 }
 0x1db   :  { %v562_v55 = vadd.f32 %v559_v54, %v416_v52  ;;  %v2259_v52 = vld [vmem:[#allocation8 + $0x120] sm:$0xff]  ;;  %2572 = vst [vmem:[#allocation36_spill] sm:$0xff] %v2261_v53  ;;  %v2266_v54 = vld [vmem:[#allocation8 + $0x110] sm:$0xff] }
 0x1dc   :  { %2571 = vst [vmem:[#allocation35_spill] sm:$0xff] %v2259_v52  ;;  %826 = vmatpush.msra.mxu1 %v2259_v52  ;;  %866 = vmatpush.msra.mxu3 %v2261_v53 }
 0x1dd   :  { %v1438_v56 = vpop.eup %1437  ;;  %1439 = vtanh.f32 %v562_v55  ;;  %v2268_v55 = vld [vmem:[#allocation8 + $0x118] sm:$0xff] }
 0x1de   :  { %566 = vst [vmem:[#allocation11 + $0x10] sm:$0xff] %v1438_v56  ;;  %653 = vmatmul.f32.vlgmr.msrb.gmra.mxu0 %v1438_v56  ;;  %693 = vmatmul.f32.vlgmr.msrb.gmra.mxu2 %v1438_v56  ;;  %v2274_v56 = vld [vmem:[#allocation8 + $0x100] sm:$0xff] }
 0x1df   :  { %949 = vmatpush.msrb.mxu0 %v2085_v24  ;;  %989 = vmatpush.msrb.mxu2 %v2087_v25 }
 0x1e0   :  { %827 = vmatpush.msra.mxu1 %v2266_v54  ;;  %867 = vmatpush.msra.mxu3 %v2268_v55 }
 0x1e1   :  { %950 = vmatpush.msrb.mxu0 %v2089_v26  ;;  %990 = vmatpush.msrb.mxu2 %v2093_v27 }
 0x1e2   :  { %828 = vmatpush.msra.mxu1 %v2274_v56 }
 0x1e3   :  { %v1440_v57 = vpop.eup %1439  ;;  %951 = vmatpush.msrb.mxu0 %v2095_v28  ;;  %991 = vmatpush.msrb.mxu2 %v2097_v29 }
 0x1e4   :  { %568 = vst [vmem:[#allocation12 + $0x28] sm:$0xff] %v1440_v57  ;;  %673 = vmatmul.f32.vlgmr.msrb.gmra.mxu1 %v1440_v57  ;;  %713 = vmatmul.f32.vlgmr.msrb.gmra.mxu3 %v1440_v57  ;;  %v2276_v57 = vld [vmem:[#allocation8 + $0x108] sm:$0xff] }
 0x1e5   :  { %868 = vmatpush.msra.mxu3 %v2276_v57  ;;  %952 = vmatpush.msrb.mxu0 %v2107_v33 }
 0x1e6   :  { %969 = vmatpush.msrb.mxu1 %v2099_v30  ;;  %992 = vmatpush.msrb.mxu2 %v2110_v34 }
 0x1e7   :  { %1009 = vmatpush.msrb.mxu3 %v2103_v31  ;;  %953 = vmatpush.msrb.mxu0 %v2121_v38 }
 0x1e8   :  { %970 = vmatpush.msrb.mxu1 %v2105_v32  ;;  %993 = vmatpush.msrb.mxu2 %v2124_v39 }
 0x1e9   :  { %1010 = vmatpush.msrb.mxu3 %v2113_v35  ;;  %954 = vmatpush.msrb.mxu0 %v2133_v42 }
 0x1ea   :  { %971 = vmatpush.msrb.mxu1 %v2117_v36  ;;  %994 = vmatpush.msrb.mxu2 %v2136_v43 }
 0x1eb   :  { %1011 = vmatpush.msrb.mxu3 %v2119_v37  ;;  %955 = vmatpush.msrb.mxu0 %v2141_v44 }
 0x1ec   :  { %972 = vmatpush.msrb.mxu1 %v2129_v40  ;;  %995 = vmatpush.msrb.mxu2 %v2144_v45 }
 0x1ed   :  { %1012 = vmatpush.msrb.mxu3 %v2131_v41  ;;  %956 = vmatpush.msrb.mxu0 %v2151_v58  ;;  %v570_v58 = vld [vmem:[#allocation3 + $0x18] sm:$0xff] }
 0x1ee   :  { %973 = vmatpush.msrb.mxu1 %v2153_v59  ;;  %996 = vmatpush.msrb.mxu2 %v2155_v62 }
 0x1ef   :  { %1013 = vmatpush.msrb.mxu3 %v2159_v63  ;;  %957 = vmatpush.msrb.mxu0 %v2161_v60 }
 0x1f0   :  { %974 = vmatpush.msrb.mxu1 %v2163_v61  ;;  %997 = vmatpush.msrb.mxu2 %v2167_v0 }
 0x1f1   :  { %1014 = vmatpush.msrb.mxu3 %v2169_v1  ;;  %958 = vmatpush.msrb.mxu0 %v2171_v2 }
 0x1f2   :  { %975 = vmatpush.msrb.mxu1 %v2175_v3  ;;  %998 = vmatpush.msrb.mxu2 %v2177_v4 }
 0x1f3   :  { %1015 = vmatpush.msrb.mxu3 %v2179_v5  ;;  %959 = vmatpush.msrb.mxu0 %v2187_v6 }
 0x1f4   :  { %976 = vmatpush.msrb.mxu1 %v2189_v7  ;;  %999 = vmatpush.msrb.mxu2 %v2191_v8 }
 0x1f5   :  { %1016 = vmatpush.msrb.mxu3 %v2195_v9  ;;  %960 = vmatpush.msrb.mxu0 %v2199_v10 }
 0x1f6   :  { %977 = vmatpush.msrb.mxu1 %v2201_v11  ;;  %1000 = vmatpush.msrb.mxu2 %v2203_v12 }
 0x1f7   :  { %1017 = vmatpush.msrb.mxu3 %v2207_v13  ;;  %961 = vmatpush.msrb.mxu0 %v2211_v14 }
 0x1f8   :  { %978 = vmatpush.msrb.mxu1 %v2213_v15  ;;  %1001 = vmatpush.msrb.mxu2 %v2215_v16 }
 0x1f9   :  { %1018 = vmatpush.msrb.mxu3 %v2219_v17  ;;  %962 = vmatpush.msrb.mxu0 %v2223_v18 }
 0x1fa   :  { %979 = vmatpush.msrb.mxu1 %v2225_v19  ;;  %1002 = vmatpush.msrb.mxu2 %v2227_v20 }
 0x1fb   :  { %1019 = vmatpush.msrb.mxu3 %v2231_v21  ;;  %963 = vmatpush.msrb.mxu0 %v2235_v22 }
 0x1fc   :  { %980 = vmatpush.msrb.mxu1 %v2237_v23  ;;  %1003 = vmatpush.msrb.mxu2 %v2241_v46 }
 0x1fd   :  { %1020 = vmatpush.msrb.mxu3 %v2243_v47  ;;  %964 = vmatpush.msrb.mxu0 %v2247_v48 }
 0x1fe   :  { %981 = vmatpush.msrb.mxu1 %v2249_v49  ;;  %1004 = vmatpush.msrb.mxu2 %v2251_v50 }
 0x1ff   :  { %1021 = vmatpush.msrb.mxu3 %v2255_v51 }
 0x200   :  { %982 = vmatpush.msrb.mxu1 %v2259_v52 }
 0x201   :  { %1022 = vmatpush.msrb.mxu3 %v2261_v53 }
 0x202   :  { %983 = vmatpush.msrb.mxu1 %v2266_v54 }
 0x203   :  { %1023 = vmatpush.msrb.mxu3 %v2268_v55 }
 0x204   :  { %984 = vmatpush.msrb.mxu1 %v2274_v56 }
 0x205   :  { %1024 = vmatpush.msrb.mxu3 %v2276_v57 }
 0x25b   :  { %v654_v45 = vpop.f32.mrf.mxu0 }
 0x261   :  { %v674_v44 = vpop.f32.mrf.mxu1 }
 0x262   :  { %v675_v62 = vadd.f32 %v674_v44, %v654_v45  ;;  %v694_v44 = vpop.f32.mrf.mxu2  ;;  %v572_v45 = vld [vmem:[#allocation6 + $0x20] sm:$0xff] }
 0x264   :  { %v717_v0 = vadd.f32 %v675_v62, %v570_v58 }
 0x266   :  { %1441 = vtanh.f32 %v717_v0 }
 0x267   :  { %v714_v6 = vpop.f32.mrf.mxu3 }
 0x268   :  { %v715_v58 = vadd.f32 %v714_v6, %v694_v44  ;;  %v2573_v44 = vld [vmem:[#allocation20_spill] sm:$0xff] }
 0x26a   :  { %v718_v62 = vadd.f32 %v715_v58, %v572_v45  ;;  %v2574_v45 = vld [vmem:[#allocation27_spill] sm:$0xff]  ;;  %v2575_v58 = vld [vmem:[#allocation22_spill] sm:$0xff] }
 0x26c   :  { %v1442_v0 = vpop.eup %1441  ;;  %1443 = vtanh.f32 %v718_v62  ;;  %v2576_v62 = vld [vmem:[#allocation24_spill] sm:$0xff] }
 0x26d   :  { %722 = vst [vmem:[#allocation11 + $0x18] sm:$0xff] %v1442_v0  ;;  %809 = vmatmul.f32.vlgmr.msra.gmra.mxu0 %v1442_v0  ;;  %849 = vmatmul.f32.vlgmr.msra.gmra.mxu2 %v1442_v0  ;;  %v2577_v0 = vld [vmem:[#allocation21_spill] sm:$0xff] }
 0x26e   :  { %1105 = vmatpush.msra.mxu0 %v2085_v24  ;;  %1145 = vmatpush.msra.mxu2 %v2087_v25 }
 0x270   :  { %1106 = vmatpush.msra.mxu0 %v2089_v26  ;;  %1146 = vmatpush.msra.mxu2 %v2093_v27 }
 0x272   :  { %v1444_v6 = vpop.eup %1443  ;;  %1107 = vmatpush.msra.mxu0 %v2095_v28  ;;  %1147 = vmatpush.msra.mxu2 %v2097_v29 }
 0x273   :  { %724 = vst [vmem:[#allocation12 + $0x20] sm:$0xff] %v1444_v6  ;;  %829 = vmatmul.f32.vlgmr.msra.gmra.mxu1 %v1444_v6  ;;  %869 = vmatmul.f32.vlgmr.msra.gmra.mxu3 %v1444_v6  ;;  %v2578_v6 = vld [vmem:[#allocation30_spill] sm:$0xff] }
 0x274   :  { %1125 = vmatpush.msra.mxu1 %v2099_v30  ;;  %1165 = vmatpush.msra.mxu3 %v2103_v31 }
 0x275   :  { %1108 = vmatpush.msra.mxu0 %v2107_v33  ;;  %1148 = vmatpush.msra.mxu2 %v2110_v34 }
 0x276   :  { %1126 = vmatpush.msra.mxu1 %v2105_v32  ;;  %1166 = vmatpush.msra.mxu3 %v2113_v35 }
 0x277   :  { %1109 = vmatpush.msra.mxu0 %v2121_v38  ;;  %1149 = vmatpush.msra.mxu2 %v2124_v39 }
 0x278   :  { %1127 = vmatpush.msra.mxu1 %v2117_v36  ;;  %1167 = vmatpush.msra.mxu3 %v2119_v37 }
 0x279   :  { %1110 = vmatpush.msra.mxu0 %v2133_v42  ;;  %1150 = vmatpush.msra.mxu2 %v2136_v43 }
 0x27a   :  { %1128 = vmatpush.msra.mxu1 %v2129_v40  ;;  %1168 = vmatpush.msra.mxu3 %v2131_v41 }
 0x27b   :  { %1111 = vmatpush.msra.mxu0 %v2573_v44  ;;  %1151 = vmatpush.msra.mxu2 %v2574_v45 }
 0x27c   :  { %1129 = vmatpush.msra.mxu1 %v2153_v59  ;;  %1169 = vmatpush.msra.mxu3 %v2159_v63 }
 0x27d   :  { %1112 = vmatpush.msra.mxu0 %v2575_v58  ;;  %1152 = vmatpush.msra.mxu2 %v2576_v62 }
 0x27e   :  { %1130 = vmatpush.msra.mxu1 %v2163_v61  ;;  %1170 = vmatpush.msra.mxu3 %v2169_v1 }
 0x27f   :  { %1113 = vmatpush.msra.mxu0 %v2161_v60  ;;  %1153 = vmatpush.msra.mxu2 %v2577_v0 }
 0x280   :  { %1131 = vmatpush.msra.mxu1 %v2175_v3  ;;  %1171 = vmatpush.msra.mxu3 %v2179_v5 }
 0x281   :  { %1114 = vmatpush.msra.mxu0 %v2171_v2  ;;  %1154 = vmatpush.msra.mxu2 %v2177_v4 }
 0x282   :  { %1132 = vmatpush.msra.mxu1 %v2189_v7  ;;  %1172 = vmatpush.msra.mxu3 %v2195_v9 }
 0x283   :  { %1115 = vmatpush.msra.mxu0 %v2578_v6  ;;  %1155 = vmatpush.msra.mxu2 %v2191_v8 }
 0x284   :  { %1133 = vmatpush.msra.mxu1 %v2201_v11  ;;  %1173 = vmatpush.msra.mxu3 %v2207_v13 }
 0x285   :  { %1116 = vmatpush.msra.mxu0 %v2199_v10  ;;  %1156 = vmatpush.msra.mxu2 %v2203_v12 }
 0x286   :  { %1134 = vmatpush.msra.mxu1 %v2213_v15  ;;  %1174 = vmatpush.msra.mxu3 %v2219_v17 }
 0x287   :  { %1117 = vmatpush.msra.mxu0 %v2211_v14  ;;  %1157 = vmatpush.msra.mxu2 %v2215_v16 }
 0x288   :  { %1135 = vmatpush.msra.mxu1 %v2225_v19  ;;  %1175 = vmatpush.msra.mxu3 %v2231_v21 }
 0x289   :  { %1118 = vmatpush.msra.mxu0 %v2223_v18  ;;  %1158 = vmatpush.msra.mxu2 %v2227_v20 }
 0x28a   :  { %1136 = vmatpush.msra.mxu1 %v2237_v23  ;;  %1176 = vmatpush.msra.mxu3 %v2243_v47 }
 0x28b   :  { %1119 = vmatpush.msra.mxu0 %v2235_v22  ;;  %1159 = vmatpush.msra.mxu2 %v2241_v46 }
 0x28c   :  { %1137 = vmatpush.msra.mxu1 %v2249_v49  ;;  %1177 = vmatpush.msra.mxu3 %v2255_v51  ;;  %v726_v49 = vld [vmem:[#allocation3 + $0x20] sm:$0xff] }
 0x28d   :  { %1120 = vmatpush.msra.mxu0 %v2247_v48  ;;  %1160 = vmatpush.msra.mxu2 %v2251_v50  ;;  %v728_v50 = vld [vmem:[#allocation6 + $0x18] sm:$0xff] }
 0x28e   :  { %1138 = vmatpush.msra.mxu1 %v2259_v52  ;;  %1178 = vmatpush.msra.mxu3 %v2261_v53 }
 0x290   :  { %1139 = vmatpush.msra.mxu1 %v2266_v54  ;;  %1179 = vmatpush.msra.mxu3 %v2268_v55 }
 0x292   :  { %1140 = vmatpush.msra.mxu1 %v2274_v56  ;;  %1180 = vmatpush.msra.mxu3 %v2276_v57 }
 0x2ea   :  { %v810_v47 = vpop.f32.mrf.mxu0 }
 0x2f0   :  { %v830_v46 = vpop.f32.mrf.mxu1  ;;  %v850_v48 = vpop.f32.mrf.mxu2 }
 0x2f1   :  { %v831_v51 = vadd.f32 %v830_v46, %v810_v47 }
 0x2f3   :  { %v873_v23 = vadd.f32 %v831_v51, %v726_v49 }
 0x2f5   :  { %1445 = vtanh.f32 %v873_v23 }
 0x2f6   :  { %v870_v22 = vpop.f32.mrf.mxu3 }
 0x2f7   :  { %v871_v52 = vadd.f32 %v870_v22, %v850_v48 }
 0x2f9   :  { %v874_v21 = vadd.f32 %v871_v52, %v728_v50 }
 0x2fb   :  { %v1446_v53 = vpop.eup %1445  ;;  %1447 = vtanh.f32 %v874_v21 }
 0x2fc   :  { %878 = vst [vmem:[#allocation11 + $0x20] sm:$0xff] %v1446_v53  ;;  %965 = vmatmul.f32.vlgmr.msrb.gmra.mxu0 %v1446_v53  ;;  %1005 = vmatmul.f32.vlgmr.msrb.gmra.mxu2 %v1446_v53 }
 0x2fd   :  { %1260 = vmatpush.msrb.mxu0 %v2085_v24  ;;  %1300 = vmatpush.msrb.mxu2 %v2087_v25  ;;  %v2579_v24 = vld [vmem:[#allocation25_spill] sm:$0xff]  ;;  %v2580_v25 = vld [vmem:[#allocation28_spill] sm:$0xff] }
 0x2ff   :  { %1261 = vmatpush.msrb.mxu0 %v2089_v26  ;;  %1301 = vmatpush.msrb.mxu2 %v2093_v27  ;;  %v2581_v26 = vld [vmem:[#allocation23_spill] sm:$0xff]  ;;  %v2582_v27 = vld [vmem:[#allocation29_spill] sm:$0xff] }
 0x301   :  { %v1448_v46 = vpop.eup %1447  ;;  %1262 = vmatpush.msrb.mxu0 %v2095_v28  ;;  %1302 = vmatpush.msrb.mxu2 %v2097_v29  ;;  %v2583_v28 = vld [vmem:[#allocation31_spill] sm:$0xff]  ;;  %v2584_v29 = vld [vmem:[#allocation26_spill] sm:$0xff] }
 0x302   :  { %880 = vst [vmem:[#allocation12 + $0x18] sm:$0xff] %v1448_v46  ;;  %985 = vmatmul.f32.vlgmr.msrb.gmra.mxu1 %v1448_v46  ;;  %1025 = vmatmul.f32.vlgmr.msrb.gmra.mxu3 %v1448_v46 }
 0x303   :  { %1263 = vmatpush.msrb.mxu0 %v2107_v33  ;;  %1280 = vmatpush.msrb.mxu1 %v2099_v30  ;;  %v2585_v30 = vld [vmem:[#allocation32_spill] sm:$0xff]  ;;  %v2588_v33 = vld [vmem:[#allocation35_spill] sm:$0xff] }
 0x304   :  { %1303 = vmatpush.msrb.mxu2 %v2110_v34  ;;  %1320 = vmatpush.msrb.mxu3 %v2103_v31  ;;  %v2586_v31 = vld [vmem:[#allocation33_spill] sm:$0xff]  ;;  %v2589_v34 = vld [vmem:[#allocation36_spill] sm:$0xff] }
 0x305   :  { %1264 = vmatpush.msrb.mxu0 %v2121_v38  ;;  %1281 = vmatpush.msrb.mxu1 %v2105_v32  ;;  %v2587_v32 = vld [vmem:[#allocation34_spill] sm:$0xff] }
 0x306   :  { %1304 = vmatpush.msrb.mxu2 %v2124_v39  ;;  %1321 = vmatpush.msrb.mxu3 %v2113_v35 }
 0x307   :  { %1265 = vmatpush.msrb.mxu0 %v2133_v42  ;;  %1282 = vmatpush.msrb.mxu1 %v2117_v36  ;;  %v882_v36 = vld [vmem:[#allocation3 + $0x28] sm:$0xff] }
 0x308   :  { %1305 = vmatpush.msrb.mxu2 %v2136_v43  ;;  %1322 = vmatpush.msrb.mxu3 %v2119_v37 }
 0x309   :  { %1266 = vmatpush.msrb.mxu0 %v2573_v44  ;;  %1283 = vmatpush.msrb.mxu1 %v2129_v40 }
 0x30a   :  { %1306 = vmatpush.msrb.mxu2 %v2574_v45  ;;  %1323 = vmatpush.msrb.mxu3 %v2131_v41  ;;  %v884_v41 = vld [vmem:[#allocation6 + $0x10] sm:$0xff] }
 0x30b   :  { %1267 = vmatpush.msrb.mxu0 %v2575_v58  ;;  %1284 = vmatpush.msrb.mxu1 %v2153_v59 }
 0x30c   :  { %1307 = vmatpush.msrb.mxu2 %v2576_v62  ;;  %1324 = vmatpush.msrb.mxu3 %v2159_v63 }
 0x30d   :  { %1268 = vmatpush.msrb.mxu0 %v2161_v60  ;;  %1285 = vmatpush.msrb.mxu1 %v2163_v61 }
 0x30e   :  { %1308 = vmatpush.msrb.mxu2 %v2577_v0  ;;  %1325 = vmatpush.msrb.mxu3 %v2169_v1  ;;  %v1038_v1 = vld [vmem:[#allocation3 + $0x30] sm:$0xff] }
 0x30f   :  { %1269 = vmatpush.msrb.mxu0 %v2171_v2  ;;  %1286 = vmatpush.msrb.mxu1 %v2175_v3 }
 0x310   :  { %1309 = vmatpush.msrb.mxu2 %v2177_v4  ;;  %1326 = vmatpush.msrb.mxu3 %v2179_v5 }
 0x311   :  { %1270 = vmatpush.msrb.mxu0 %v2578_v6  ;;  %1287 = vmatpush.msrb.mxu1 %v2189_v7  ;;  %v1040_v7 = vld [vmem:[#allocation6 + $0x8] sm:$0xff] }
 0x312   :  { %1310 = vmatpush.msrb.mxu2 %v2191_v8  ;;  %1327 = vmatpush.msrb.mxu3 %v2195_v9 }
 0x313   :  { %1271 = vmatpush.msrb.mxu0 %v2199_v10  ;;  %1288 = vmatpush.msrb.mxu1 %v2201_v11 }
 0x314   :  { %1311 = vmatpush.msrb.mxu2 %v2203_v12  ;;  %1328 = vmatpush.msrb.mxu3 %v2207_v13 }
 0x315   :  { %1272 = vmatpush.msrb.mxu0 %v2211_v14  ;;  %1289 = vmatpush.msrb.mxu1 %v2213_v15  ;;  %v1194_v14 = vld [vmem:[#allocation3 + $0x38] sm:$0xff] }
 0x316   :  { %1312 = vmatpush.msrb.mxu2 %v2215_v16  ;;  %1329 = vmatpush.msrb.mxu3 %v2219_v17 }
 0x317   :  { %1273 = vmatpush.msrb.mxu0 %v2223_v18  ;;  %1290 = vmatpush.msrb.mxu1 %v2225_v19  ;;  %v1195_v19 = vld [vmem:[#allocation6] sm:$0xff] }
 0x318   :  { %1313 = vmatpush.msrb.mxu2 %v2227_v20  ;;  %1330 = vmatpush.msrb.mxu3 %v2579_v24 }
 0x319   :  { %1274 = vmatpush.msrb.mxu0 %v2580_v25  ;;  %1291 = vmatpush.msrb.mxu1 %v2581_v26 }
 0x31a   :  { %1314 = vmatpush.msrb.mxu2 %v2582_v27  ;;  %1331 = vmatpush.msrb.mxu3 %v2583_v28 }
 0x31b   :  { %1275 = vmatpush.msrb.mxu0 %v2584_v29  ;;  %1292 = vmatpush.msrb.mxu1 %v2585_v30 }
 0x31c   :  { %1315 = vmatpush.msrb.mxu2 %v2586_v31  ;;  %1332 = vmatpush.msrb.mxu3 %v2587_v32 }
 0x31d   :  { %1293 = vmatpush.msrb.mxu1 %v2588_v33 }
 0x31e   :  { %1333 = vmatpush.msrb.mxu3 %v2589_v34 }
 0x31f   :  { %1294 = vmatpush.msrb.mxu1 %v2266_v54 }
 0x320   :  { %1334 = vmatpush.msrb.mxu3 %v2268_v55 }
 0x321   :  { %1295 = vmatpush.msrb.mxu1 %v2274_v56 }
 0x322   :  { %1335 = vmatpush.msrb.mxu3 %v2276_v57 }
 0x379   :  { %v966_v35 = vpop.f32.mrf.mxu0 }
 0x37f   :  { %v986_v37 = vpop.f32.mrf.mxu1  ;;  %v1006_v40 = vpop.f32.mrf.mxu2 }
 0x380   :  { %v987_v38 = vadd.f32 %v986_v37, %v966_v35 }
 0x382   :  { %v1029_v39 = vadd.f32 %v987_v38, %v882_v36 }
 0x384   :  { %1449 = vtanh.f32 %v1029_v39 }
 0x385   :  { %v1026_v42 = vpop.f32.mrf.mxu3 }
 0x386   :  { %v1027_v43 = vadd.f32 %v1026_v42, %v1006_v40 }
 0x388   :  { %v1030_v59 = vadd.f32 %v1027_v43, %v884_v41 }
 0x38a   :  { %v1450_v63 = vpop.eup %1449  ;;  %1451 = vtanh.f32 %v1030_v59 }
 0x38b   :  { %1034 = vst [vmem:[#allocation11 + $0x28] sm:$0xff] %v1450_v63  ;;  %1121 = vmatmul.f32.vlgmr.msra.gmra.mxu0 %v1450_v63  ;;  %1161 = vmatmul.f32.vlgmr.msra.gmra.mxu2 %v1450_v63 }
 0x390   :  { %v1452_v60 = vpop.eup %1451 }
 0x391   :  { %1036 = vst [vmem:[#allocation12 + $0x10] sm:$0xff] %v1452_v60  ;;  %1141 = vmatmul.f32.vlgmr.msra.gmra.mxu1 %v1452_v60  ;;  %1181 = vmatmul.f32.vlgmr.msra.gmra.mxu3 %v1452_v60 }
 0x408   :  { %v1122_v61 = vpop.f32.mrf.mxu0 }
 0x40e   :  { %v1142_v2 = vpop.f32.mrf.mxu1  ;;  %v1162_v5 = vpop.f32.mrf.mxu2 }
 0x40f   :  { %v1143_v3 = vadd.f32 %v1142_v2, %v1122_v61 }
 0x411   :  { %v1185_v4 = vadd.f32 %v1143_v3, %v1038_v1 }
 0x413   :  { %1453 = vtanh.f32 %v1185_v4 }
 0x414   :  { %v1182_v8 = vpop.f32.mrf.mxu3 }
 0x415   :  { %v1183_v9 = vadd.f32 %v1182_v8, %v1162_v5 }
 0x417   :  { %v1186_v10 = vadd.f32 %v1183_v9, %v1040_v7 }
 0x419   :  { %v1454_v11 = vpop.eup %1453  ;;  %1455 = vtanh.f32 %v1186_v10 }
 0x41a   :  { %1190 = vst [vmem:[#allocation11 + $0x30] sm:$0xff] %v1454_v11  ;;  %1276 = vmatmul.f32.vlgmr.msrb.gmra.mxu0 %v1454_v11  ;;  %1316 = vmatmul.f32.vlgmr.msrb.gmra.mxu2 %v1454_v11 }
 0x41f   :  { %v1456_v12 = vpop.eup %1455 }
 0x420   :  { %1192 = vst [vmem:[#allocation12 + $0x8] sm:$0xff] %v1456_v12  ;;  %1296 = vmatmul.f32.vlgmr.msrb.gmra.mxu1 %v1456_v12  ;;  %1336 = vmatmul.f32.vlgmr.msrb.gmra.mxu3 %v1456_v12 }
 0x497   :  { %v1277_v13 = vpop.f32.mrf.mxu0 }
 0x49d   :  { %v1297_v15 = vpop.f32.mrf.mxu1  ;;  %v1317_v18 = vpop.f32.mrf.mxu2 }
 0x49e   :  { %v1298_v16 = vadd.f32 %v1297_v15, %v1277_v13 }
 0x4a0   :  { %v1340_v17 = vadd.f32 %v1298_v16, %v1194_v14 }
 0x4a2   :  { %1457 = vtanh.f32 %v1340_v17 }
 0x4a3   :  { %v1337_v20 = vpop.f32.mrf.mxu3 }
 0x4a4   :  { %v1338_v21 = vadd.f32 %v1337_v20, %v1317_v18 }
 0x4a6   :  { %v1341_v22 = vadd.f32 %v1338_v21, %v1195_v19 }
 0x4a8   :  { %v1458_v23 = vpop.eup %1457  ;;  %1459 = vtanh.f32 %v1341_v22 }
 0x4a9   :  { %1345 = vst [vmem:[#allocation11 + $0x38] sm:$0xff] %v1458_v23 }
 0x4aa   :  { %1352 = vst [vmem:[#allocation14] sm:$0xff] %v1458_v23  ;;  %1366 = dma.vmem_to_hbm [thread:$0]  %s1359_s3, 1024, %s1361_s22, [#allocation5], %s1641_s7, %s1641_s7, %s1642_s8  }
 0x4ae   :  { %v1460_v47 = vpop.eup %1459 }
 0x4af   :  { %1346 = vst [vmem:[#allocation12] sm:$0xff] %v1460_v47 }
 0x4b0   :  { %1353 = vst [vmem:[#allocation14 + $0x8] sm:$0xff] %v1460_v47  ;;  %1383 = dma.vmem_to_hbm [thread:$0]  %s1376_s24, 1024, %s1378_s27, [#allocation13], %s1641_s7, %s1641_s7, %s1642_s8  }
 0x4b1   :  { %1394 = dma.vmem_to_hbm [thread:$0]  %s1390_s29, 256, %s1392_s9, [#allocation13]  }
 0x4b2   :  { %1635 = dma.done.wait [#allocation5], 1024  }
 0x4b3   :  { %1636 = vsyncadd [#allocation5], 4294966272 }
 0x4b4   :  { %1637 = dma.done.wait [#allocation13], 1280  }
 0x4b5   :  { %1638 = vsyncadd [#allocation13], 4294966016 }
 0x4b6   :  { %1407 = vsyncpa [#allocation4], 1 }
 0x4b7   :  { %1408 = vsyncpa [#allocation7], 1 }
 0x4b8   :  { %1409 = vsyncpa [#allocation10], 1 }
 0x4b9   :  { %1410 = vsyncpa [#allocation5], 1 }
 0x4ba   :  { %1411 = vsyncpa [#allocation13], 1 }

</bundles_post_ra>
